<compile_context>
chip_gen: v7x
topology: tpu7x:2x2x1
jax: 0.10.0
libtpu: 0.0.40
codegen_flags: <defaults>
</compile_context>

<pallas_src>
import math
import functools

import jax
import jax.numpy as jnp
from jax.experimental import pallas as pl
from jax.experimental.pallas import tpu as pltpu


# ------------------------ fused ECA + 2-layer LSTM + FC kernel -----------------------
def _fused_kernel(seq_ref, m1_ref, exp_ref, wih0_ref, whh0_ref, b0_ref,
                  wih1_ref, whh1_ref, b1_ref, wfc_ref, bfc_ref,
                  out_ref, state_ref, *, T, NP, H):
    f32 = jnp.float32
    bf16 = jnp.bfloat16

    # ---------------- ECA, batched over all T*NP rows (lane-dense matmuls) ----------------
    x = seq_ref[...]                                                          # (T*NP, D) f32
    logits = jnp.dot(x.astype(bf16), m1_ref[...],
                     preferred_element_type=f32)                              # (T*NP, V)
    attn = jax.nn.sigmoid(logits)                                             # f32 elementwise
    scale = jnp.dot(attn.astype(bf16), exp_ref[...],
                    preferred_element_type=f32)                               # (T*NP, D)
    xs = x * scale

    # ---------- layer-0 input projection hoisted out of the serial recurrence ----------
    g0_all = (jnp.dot(xs.astype(bf16), wih0_ref[...], preferred_element_type=f32)
              + b0_ref[...])                                                  # (T*NP, 4H)

    # torch gate order along lanes: [0:H]=i, [H:2H]=f, [2H:3H]=g, [3H:4H]=o
    lane = jax.lax.broadcasted_iota(jnp.int32, (NP, 4 * H), 1)
    is_g = (lane >= 2 * H) & (lane < 3 * H)
    two_in_g = jnp.where(is_g, 2.0, 1.0).astype(f32)     # hoisted constants (traced once)
    neg1_in_g = jnp.where(is_g, -1.0, 0.0).astype(f32)

    def cell(pre, c_prev):
        # One EUP pass: sigmoid for i/f/o lanes; tanh(x) = 2*sigmoid(2x) - 1 for g lanes.
        s = jax.nn.sigmoid(pre * two_in_g)
        act = s * two_in_g + neg1_in_g                                        # (NP, 4H)
        i_g = act[:, 0:H]
        f_g = act[:, H:2 * H]
        g_g = act[:, 2 * H:3 * H]
        o_g = act[:, 3 * H:4 * H]
        c_new = f_g * c_prev + i_g * g_g
        h_new = o_g * jnp.tanh(c_new)
        return h_new, c_new

    whh0 = whh0_ref[...]
    wih1 = wih1_ref[...]
    whh1 = whh1_ref[...]
    b1b = jnp.broadcast_to(b1_ref[...], (NP, 4 * H))      # broadcast once, not T times

    zeros = jnp.zeros((NP, H), f32)
    h0, c0, h1, c1 = zeros, zeros, zeros, zeros
    # TODO(synk): initial hidden state fixed to zeros (module's hidden=None path); a
    # caller-provided (h0, c0) is not plumbed into the kernel.
    r1 = b1b                                              # h1_prev = 0  ->  r1 = b1
    h1_steps = []

    # Fully-unrolled serial recurrence (T small & static -> aligned static slices).
    # NOTE(v7x): g0/g1 are written acc-style so Mosaic can fuse the add into the MRB.
    for t in range(T):
        g0 = (g0_all[t * NP:(t + 1) * NP, :]
              + jnp.dot(h0.astype(bf16), whh0, preferred_element_type=f32))
        h0, c0 = cell(g0, c0)
        # Critical path: only the K=H push h0_new @ wih1; whh1 term was precomputed off-path.
        g1 = jnp.dot(h0.astype(bf16), wih1, preferred_element_type=f32) + r1
        h1, c1 = cell(g1, c1)
        h1_steps.append(h1)
        if t + 1 < T:
            # Off the critical path: next step's recurrent term (overlaps layer-0 cell work).
            r1 = jnp.dot(h1.astype(bf16), whh1, preferred_element_type=f32) + b1b

    # -------------------- batched lane-dense FC epilogue + final states --------------------
    h1_all = jnp.concatenate(h1_steps, axis=0)                                # (T*NP, H)
    out_ref[...] = (jnp.dot(h1_all.astype(bf16), wfc_ref[...],
                            preferred_element_type=f32) + bfc_ref[...])       # (T*NP, CP)
    # Pack [h_l0 | h_l1 | c_l0 | c_l1] along lanes: one (NP, 4H)=(·,128) unmasked store.
    state_ref[...] = jnp.concatenate([h0, h1, c0, c1], axis=1)


# --------------------------------- full forward ----------------------------------
def view_aware_lstm_forward(x, params, H, C):
    """x: (N, T, F, XY, V) f32.  Returns (out (N,T,C), (h_n, c_n) each (2,N,H))."""
    N, T, Fd, XY, V = x.shape
    FXY = Fd * XY
    D = V * FXY
    NP = ((N + 7) // 8) * 8            # pad batch rows to a sublane multiple
    CP = ((C + 127) // 128) * 128      # lane-dense FC output width

    # torch flattening order: permute(0,1,4,2,3).reshape(N,T,V*F*XY); here time-major + pad.
    seq = jnp.transpose(x, (1, 0, 4, 2, 3)).reshape(T, N, D)
    if NP != N:
        seq = jnp.pad(seq, ((0, 0), (0, NP - N), (0, 0)))
    seq = seq.reshape(T * NP, D).astype(jnp.float32)

    # Fold per-view mean-pool + Conv1d into one (D, V) matrix; expand scale back V -> D.
    eye = jnp.eye(V, dtype=jnp.float32)
    pool = jnp.repeat(eye, FXY, axis=0) / float(FXY)                  # (D, V)
    m1 = (pool @ params["conv_mat"].T).astype(jnp.bfloat16)           # (D, V)
    expand = jnp.repeat(eye, FXY, axis=1).astype(jnp.bfloat16)        # (V, D) (0/1: exact)

    bf = lambda a: a.astype(jnp.bfloat16)
    wfc_pad = jnp.pad(params["wfc"], ((0, 0), (0, CP - C)))
    bfc_pad = jnp.pad(params["bfc"], ((0, 0), (0, CP - C)))

    args = (seq, m1, expand,
            bf(params["wih0"]), bf(params["whh0"]), params["b0"],
            bf(params["wih1"]), bf(params["whh1"]), params["b1"],
            bf(wfc_pad), bfc_pad)

    # Advisory cost estimate (kernel is launch/DMA dominated at these shapes).
    flops = 2 * (2 * T * NP * D * V)              # ECA logits + expand
    flops += 2 * T * NP * D * 4 * H               # layer-0 input projection
    flops += 3 * (2 * T * NP * H * 4 * H)         # whh0 + wih1 + whh1 recurrent pushes
    flops += 2 * T * NP * H * CP                  # FC epilogue
    transcendentals = T * NP * (V + 2 * 4 * H + 2 * H)
    bytes_accessed = sum(int(a.size) * a.dtype.itemsize for a in args)
    bytes_accessed += (T * NP * CP + NP * 4 * H) * 4

    out_pad, state = pl.pallas_call(
        functools.partial(_fused_kernel, T=T, NP=NP, H=H),
        out_shape=(
            jax.ShapeDtypeStruct((T * NP, CP), jnp.float32),
            jax.ShapeDtypeStruct((NP, 4 * H), jnp.float32),
        ),
        in_specs=[pl.BlockSpec(memory_space=pltpu.MemorySpace.VMEM)] * len(args),
        out_specs=(pl.BlockSpec(memory_space=pltpu.MemorySpace.VMEM),
                   pl.BlockSpec(memory_space=pltpu.MemorySpace.VMEM)),
        cost_estimate=pl.CostEstimate(flops=int(flops),
                                      transcendentals=int(transcendentals),
                                      bytes_accessed=int(bytes_accessed)),
    )(*args)

    out = jnp.transpose(out_pad.reshape(T, NP, CP)[:, :N, :C], (1, 0, 2))   # (N, T, C)
    st = state[:N]                                                          # (N, 4H)
    h_n = jnp.stack([st[:, 0:H], st[:, H:2 * H]], axis=0)                   # (2, N, H)
    c_n = jnp.stack([st[:, 2 * H:3 * H], st[:, 3 * H:4 * H]], axis=0)       # (2, N, H)
    return out, (h_n, c_n)


# ------------------------------ pure-JAX reference -------------------------------
def reference_forward(x, params, H, C):
    N, T, Fd, XY, V = x.shape
    xp = jnp.transpose(x, (0, 1, 4, 2, 3))                 # (N,T,V,F,XY)
    m = jnp.mean(xp, axis=(3, 4))                          # (N,T,V)
    a = jax.nn.sigmoid(jnp.einsum("vu,ntu->ntv", params["conv_mat"], m))
    xa = xp * a[..., None, None]
    seq = xa.reshape(N, T, V * Fd * XY)
    h = [jnp.zeros((N, H), jnp.float32), jnp.zeros((N, H), jnp.float32)]
    c = [jnp.zeros((N, H), jnp.float32), jnp.zeros((N, H), jnp.float32)]
    Ws = [(params["wih0"], params["whh0"], params["b0"]),
          (params["wih1"], params["whh1"], params["b1"])]
    outs = []
    for t in range(T):
        inp = seq[:, t]
        for l in range(2):
            wih, whh, b = Ws[l]
            g = inp @ wih + h[l] @ whh + b
            i = jax.nn.sigmoid(g[:, :H])
            f = jax.nn.sigmoid(g[:, H:2 * H])
            gg = jnp.tanh(g[:, 2 * H:3 * H])
            o = jax.nn.sigmoid(g[:, 3 * H:])
            c[l] = f * c[l] + i * gg
            h[l] = o * jnp.tanh(c[l])
            inp = h[l]
        outs.append(inp @ params["wfc"] + params["bfc"])
    out = jnp.stack(outs, axis=1)
    return out, (jnp.stack(h, axis=0), jnp.stack(c, axis=0))


# ------------------------------------ main ----------------------------------------
if __name__ == "__main__":
    # Small shapes consistent with the module: num_views must be 8 (ECA default).
    N, T, Fd, XY, V = 2, 8, 4, 16, 8
    H, C = 32, 5
    D = V * Fd * XY                                        # num_features for the LSTM

    # ECA conv kernel size, exactly as in the module __init__.
    gamma, b_eca, num_views = 2, 1, V
    t_eca = int(abs((math.log(num_views, 2) + b_eca) / gamma))
    k = t_eca if t_eca % 2 else t_eca + 1                  # -> 3

    key = jax.random.PRNGKey(0)
    ks = jax.random.split(key, 10)
    std = 1.0 / math.sqrt(H)
    u = lambda kk, shape, s: jax.random.uniform(kk, shape, jnp.float32, -s, s)

    conv_w = u(ks[0], (k,), 0.5)                           # Conv1d(1,1,k) weight, no bias
    # Banded (V,V) matrix equivalent to Conv1d (cross-correlation) over V, zero pad k//2.
    idx = jnp.arange(V)
    j = idx[None, :] - idx[:, None] + k // 2
    conv_mat = jnp.where((j >= 0) & (j < k), conv_w[jnp.clip(j, 0, k - 1)], 0.0).astype(jnp.float32)

    params = {
        "conv_mat": conv_mat,
        # LSTM weights stored pre-transposed: (in, 4H); bias = b_ih + b_hh combined.
        "wih0": u(ks[1], (D, 4 * H), std),
        "whh0": u(ks[2], (H, 4 * H), std),
        "b0":   u(ks[3], (1, 4 * H), std),
        "wih1": u(ks[4], (H, 4 * H), std),
        "whh1": u(ks[5], (H, 4 * H), std),
        "b1":   u(ks[6], (1, 4 * H), std),
        "wfc":  u(ks[7], (H, C), std),
        "bfc":  u(ks[8], (1, C), std),
    }

    x = jax.random.normal(ks[9], (N, T, Fd, XY, V), dtype=jnp.float32)

    out, (h_n, c_n) = view_aware_lstm_forward(x, params, H, C)
    jax.block_until_ready((out, h_n, c_n))

    ref_out, (ref_h, ref_c) = reference_forward(x, params, H, C)
    assert out.shape == (N, T, C) and h_n.shape == (2, N, H) and c_n.shape == (2, N, H)
    # bf16 MXU operands with f32 accumulation -> looser tolerance than the pure-f32 version.
    tol = 5e-2
    assert jnp.allclose(out, ref_out, atol=tol), float(jnp.max(jnp.abs(out - ref_out)))
    assert jnp.allclose(h_n, ref_h, atol=tol), float(jnp.max(jnp.abs(h_n - ref_h)))
    assert jnp.allclose(c_n, ref_c, atol=tol), float(jnp.max(jnp.abs(c_n - ref_c)))

    print("KERNEL_OK")
</pallas_src>

<mosaic_0001>
module attributes {stable_mosaic.version = 11 : i64} {
  func.func @_fused_kernel(%arg0: memref<64x512xf32, #tpu.memory_space<vmem>>, %arg1: memref<512x8xbf16, #tpu.memory_space<vmem>>, %arg2: memref<8x512xbf16, #tpu.memory_space<vmem>>, %arg3: memref<512x128xbf16, #tpu.memory_space<vmem>>, %arg4: memref<32x128xbf16, #tpu.memory_space<vmem>>, %arg5: memref<1x128xf32, #tpu.memory_space<vmem>>, %arg6: memref<32x128xbf16, #tpu.memory_space<vmem>>, %arg7: memref<32x128xbf16, #tpu.memory_space<vmem>>, %arg8: memref<1x128xf32, #tpu.memory_space<vmem>>, %arg9: memref<32x128xbf16, #tpu.memory_space<vmem>>, %arg10: memref<1x128xf32, #tpu.memory_space<vmem>>, %arg11: memref<64x128xf32, #tpu.memory_space<vmem>>, %arg12: memref<8x128xf32, #tpu.memory_space<vmem>>) attributes {dimension_semantics = [], scalar_prefetch = 0 : i64, scratch_operands = 0 : i64, tpu.core_type = #tpu.core_type<tc>} {
    %c0 = arith.constant 0 : index
    %c0_0 = arith.constant 0 : index
    %0 = vector.load %arg0[%c0, %c0_0] : memref<64x512xf32, #tpu.memory_space<vmem>>, vector<64x512xf32>
    %1 = arith.truncf %0 : vector<64x512xf32> to vector<64x512xbf16>
    %c0_1 = arith.constant 0 : index
    %c0_2 = arith.constant 0 : index
    %2 = vector.load %arg1[%c0_1, %c0_2] : memref<512x8xbf16, #tpu.memory_space<vmem>>, vector<512x8xbf16>
    %cst = arith.constant dense<0.000000e+00> : vector<64x8xf32>
    %3 = tpu.matmul %1, %2, %cst {dimension_numbers = #tpu.dot_dimension_numbers<[1], [0], [0], [1], [0, 0, 1, 1], [], []>} : vector<64x512xbf16>, vector<512x8xbf16>, vector<64x8xf32> -> vector<64x8xf32>
    %4 = arith.negf %3 : vector<64x8xf32>
    %5 = math.exp %4 : vector<64x8xf32>
    %cst_3 = arith.constant 1.000000e+00 : f32
    %6 = vector.broadcast %cst_3 : f32 to vector<64x8xf32>
    %7 = arith.addf %6, %5 : vector<64x8xf32>
    %8 = arith.divf %6, %7 : vector<64x8xf32>
    %9 = arith.truncf %8 : vector<64x8xf32> to vector<64x8xbf16>
    %c0_4 = arith.constant 0 : index
    %c0_5 = arith.constant 0 : index
    %10 = vector.load %arg2[%c0_4, %c0_5] : memref<8x512xbf16, #tpu.memory_space<vmem>>, vector<8x512xbf16>
    %cst_6 = arith.constant dense<0.000000e+00> : vector<64x512xf32>
    %11 = tpu.matmul %9, %10, %cst_6 {dimension_numbers = #tpu.dot_dimension_numbers<[1], [0], [0], [1], [0, 0, 1, 1], [], []>} : vector<64x8xbf16>, vector<8x512xbf16>, vector<64x512xf32> -> vector<64x512xf32>
    %12 = arith.mulf %0, %11 : vector<64x512xf32>
    %13 = arith.truncf %12 : vector<64x512xf32> to vector<64x512xbf16>
    %c0_7 = arith.constant 0 : index
    %c0_8 = arith.constant 0 : index
    %14 = vector.load %arg3[%c0_7, %c0_8] : memref<512x128xbf16, #tpu.memory_space<vmem>>, vector<512x128xbf16>
    %cst_9 = arith.constant dense<0.000000e+00> : vector<64x128xf32>
    %15 = tpu.matmul %13, %14, %cst_9 {dimension_numbers = #tpu.dot_dimension_numbers<[1], [0], [0], [1], [0, 0, 1, 1], [], []>} : vector<64x512xbf16>, vector<512x128xbf16>, vector<64x128xf32> -> vector<64x128xf32>
    %c0_10 = arith.constant 0 : index
    %c0_11 = arith.constant 0 : index
    %16 = vector.load %arg5[%c0_10, %c0_11] : memref<1x128xf32, #tpu.memory_space<vmem>>, vector<1x128xf32>
    %17 = vector.broadcast %16 : vector<1x128xf32> to vector<64x128xf32>
    %18 = arith.addf %15, %17 : vector<64x128xf32>
    %19 = tpu.iota {dimensions = array<i32: 1>} : vector<8x128xi32>
    %c64_i32 = arith.constant 64 : i32
    %20 = vector.broadcast %c64_i32 : i32 to vector<8x128xi32>
    %21 = arith.cmpi sge, %19, %20 : vector<8x128xi32>
    %c96_i32 = arith.constant 96 : i32
    %22 = vector.broadcast %c96_i32 : i32 to vector<8x128xi32>
    %23 = arith.cmpi slt, %19, %22 : vector<8x128xi32>
    %24 = arith.andi %21, %23 : vector<8x128xi1>
    %cst_12 = arith.constant 2.000000e+00 : f32
    %cst_13 = arith.constant 1.000000e+00 : f32
    %25 = vector.broadcast %cst_12 : f32 to vector<8x128xf32>
    %26 = vector.broadcast %cst_13 : f32 to vector<8x128xf32>
    %27 = arith.select %24, %25, %26 : vector<8x128xi1>, vector<8x128xf32>
    %cst_14 = arith.constant -1.000000e+00 : f32
    %cst_15 = arith.constant 0.000000e+00 : f32
    %28 = vector.broadcast %cst_14 : f32 to vector<8x128xf32>
    %29 = vector.broadcast %cst_15 : f32 to vector<8x128xf32>
    %30 = arith.select %24, %28, %29 : vector<8x128xi1>, vector<8x128xf32>
    %c0_16 = arith.constant 0 : index
    %c0_17 = arith.constant 0 : index
    %31 = vector.load %arg4[%c0_16, %c0_17] : memref<32x128xbf16, #tpu.memory_space<vmem>>, vector<32x128xbf16>
    %c0_18 = arith.constant 0 : index
    %c0_19 = arith.constant 0 : index
    %32 = vector.load %arg6[%c0_18, %c0_19] : memref<32x128xbf16, #tpu.memory_space<vmem>>, vector<32x128xbf16>
    %c0_20 = arith.constant 0 : index
    %c0_21 = arith.constant 0 : index
    %33 = vector.load %arg7[%c0_20, %c0_21] : memref<32x128xbf16, #tpu.memory_space<vmem>>, vector<32x128xbf16>
    %c0_22 = arith.constant 0 : index
    %c0_23 = arith.constant 0 : index
    %34 = vector.load %arg8[%c0_22, %c0_23] : memref<1x128xf32, #tpu.memory_space<vmem>>, vector<1x128xf32>
    %35 = vector.shape_cast %34 : vector<1x128xf32> to vector<1x128xf32>
    %36 = vector.broadcast %35 : vector<1x128xf32> to vector<8x128xf32>
    %cst_24 = arith.constant 0.000000e+00 : f32
    %37 = vector.broadcast %cst_24 : f32 to vector<8x32xf32>
    %38 = vector.extract_strided_slice %18 {offsets = [0, 0], sizes = [8, 128], strides = [1, 1]} : vector<64x128xf32> to vector<8x128xf32>
    %39 = arith.truncf %37 : vector<8x32xf32> to vector<8x32xbf16>
    %cst_25 = arith.constant dense<0.000000e+00> : vector<8x128xf32>
    %40 = tpu.matmul %39, %31, %cst_25 {dimension_numbers = #tpu.dot_dimension_numbers<[1], [0], [0], [1], [0, 0, 1, 1], [], []>} : vector<8x32xbf16>, vector<32x128xbf16>, vector<8x128xf32> -> vector<8x128xf32>
    %41 = arith.addf %38, %40 : vector<8x128xf32>
    %42 = arith.mulf %41, %27 : vector<8x128xf32>
    %43 = arith.negf %42 : vector<8x128xf32>
    %44 = math.exp %43 : vector<8x128xf32>
    %cst_26 = arith.constant 1.000000e+00 : f32
    %45 = vector.broadcast %cst_26 : f32 to vector<8x128xf32>
    %46 = arith.addf %45, %44 : vector<8x128xf32>
    %47 = arith.divf %45, %46 : vector<8x128xf32>
    %48 = arith.mulf %47, %27 : vector<8x128xf32>
    %49 = arith.addf %48, %30 : vector<8x128xf32>
    %50 = vector.extract_strided_slice %49 {offsets = [0, 0], sizes = [8, 32], strides = [1, 1]} : vector<8x128xf32> to vector<8x32xf32>
    %51 = vector.extract_strided_slice %49 {offsets = [0, 32], sizes = [8, 32], strides = [1, 1]} : vector<8x128xf32> to vector<8x32xf32>
    %52 = vector.extract_strided_slice %49 {offsets = [0, 64], sizes = [8, 32], strides = [1, 1]} : vector<8x128xf32> to vector<8x32xf32>
    %53 = vector.extract_strided_slice %49 {offsets = [0, 96], sizes = [8, 32], strides = [1, 1]} : vector<8x128xf32> to vector<8x32xf32>
    %54 = arith.mulf %51, %37 : vector<8x32xf32>
    %55 = arith.mulf %50, %52 : vector<8x32xf32>
    %56 = arith.addf %54, %55 : vector<8x32xf32>
    %57 = math.tanh %56 : vector<8x32xf32>
    %58 = arith.mulf %53, %57 : vector<8x32xf32>
    %59 = arith.truncf %58 : vector<8x32xf32> to vector<8x32xbf16>
    %cst_27 = arith.constant dense<0.000000e+00> : vector<8x128xf32>
    %60 = tpu.matmul %59, %32, %cst_27 {dimension_numbers = #tpu.dot_dimension_numbers<[1], [0], [0], [1], [0, 0, 1, 1], [], []>} : vector<8x32xbf16>, vector<32x128xbf16>, vector<8x128xf32> -> vector<8x128xf32>
    %61 = arith.addf %60, %36 : vector<8x128xf32>
    %62 = arith.mulf %61, %27 : vector<8x128xf32>
    %63 = arith.negf %62 : vector<8x128xf32>
    %64 = math.exp %63 : vector<8x128xf32>
    %cst_28 = arith.constant 1.000000e+00 : f32
    %65 = vector.broadcast %cst_28 : f32 to vector<8x128xf32>
    %66 = arith.addf %65, %64 : vector<8x128xf32>
    %67 = arith.divf %65, %66 : vector<8x128xf32>
    %68 = arith.mulf %67, %27 : vector<8x128xf32>
    %69 = arith.addf %68, %30 : vector<8x128xf32>
    %70 = vector.extract_strided_slice %69 {offsets = [0, 0], sizes = [8, 32], strides = [1, 1]} : vector<8x128xf32> to vector<8x32xf32>
    %71 = vector.extract_strided_slice %69 {offsets = [0, 32], sizes = [8, 32], strides = [1, 1]} : vector<8x128xf32> to vector<8x32xf32>
    %72 = vector.extract_strided_slice %69 {offsets = [0, 64], sizes = [8, 32], strides = [1, 1]} : vector<8x128xf32> to vector<8x32xf32>
    %73 = vector.extract_strided_slice %69 {offsets = [0, 96], sizes = [8, 32], strides = [1, 1]} : vector<8x128xf32> to vector<8x32xf32>
    %74 = arith.mulf %71, %37 : vector<8x32xf32>
    %75 = arith.mulf %70, %72 : vector<8x32xf32>
    %76 = arith.addf %74, %75 : vector<8x32xf32>
    %77 = math.tanh %76 : vector<8x32xf32>
    %78 = arith.mulf %73, %77 : vector<8x32xf32>
    %79 = arith.truncf %78 : vector<8x32xf32> to vector<8x32xbf16>
    %cst_29 = arith.constant dense<0.000000e+00> : vector<8x128xf32>
    %80 = tpu.matmul %79, %33, %cst_29 {dimension_numbers = #tpu.dot_dimension_numbers<[1], [0], [0], [1], [0, 0, 1, 1], [], []>} : vector<8x32xbf16>, vector<32x128xbf16>, vector<8x128xf32> -> vector<8x128xf32>
    %81 = arith.addf %80, %36 : vector<8x128xf32>
    %82 = vector.extract_strided_slice %18 {offsets = [8, 0], sizes = [8, 128], strides = [1, 1]} : vector<64x128xf32> to vector<8x128xf32>
    %83 = arith.truncf %58 : vector<8x32xf32> to vector<8x32xbf16>
    %cst_30 = arith.constant dense<0.000000e+00> : vector<8x128xf32>
    %84 = tpu.matmul %83, %31, %cst_30 {dimension_numbers = #tpu.dot_dimension_numbers<[1], [0], [0], [1], [0, 0, 1, 1], [], []>} : vector<8x32xbf16>, vector<32x128xbf16>, vector<8x128xf32> -> vector<8x128xf32>
    %85 = arith.addf %82, %84 : vector<8x128xf32>
    %86 = arith.mulf %85, %27 : vector<8x128xf32>
    %87 = arith.negf %86 : vector<8x128xf32>
    %88 = math.exp %87 : vector<8x128xf32>
    %cst_31 = arith.constant 1.000000e+00 : f32
    %89 = vector.broadcast %cst_31 : f32 to vector<8x128xf32>
    %90 = arith.addf %89, %88 : vector<8x128xf32>
    %91 = arith.divf %89, %90 : vector<8x128xf32>
    %92 = arith.mulf %91, %27 : vector<8x128xf32>
    %93 = arith.addf %92, %30 : vector<8x128xf32>
    %94 = vector.extract_strided_slice %93 {offsets = [0, 0], sizes = [8, 32], strides = [1, 1]} : vector<8x128xf32> to vector<8x32xf32>
    %95 = vector.extract_strided_slice %93 {offsets = [0, 32], sizes = [8, 32], strides = [1, 1]} : vector<8x128xf32> to vector<8x32xf32>
    %96 = vector.extract_strided_slice %93 {offsets = [0, 64], sizes = [8, 32], strides = [1, 1]} : vector<8x128xf32> to vector<8x32xf32>
    %97 = vector.extract_strided_slice %93 {offsets = [0, 96], sizes = [8, 32], strides = [1, 1]} : vector<8x128xf32> to vector<8x32xf32>
    %98 = arith.mulf %95, %56 : vector<8x32xf32>
    %99 = arith.mulf %94, %96 : vector<8x32xf32>
    %100 = arith.addf %98, %99 : vector<8x32xf32>
    %101 = math.tanh %100 : vector<8x32xf32>
    %102 = arith.mulf %97, %101 : vector<8x32xf32>
    %103 = arith.truncf %102 : vector<8x32xf32> to vector<8x32xbf16>
    %cst_32 = arith.constant dense<0.000000e+00> : vector<8x128xf32>
    %104 = tpu.matmul %103, %32, %cst_32 {dimension_numbers = #tpu.dot_dimension_numbers<[1], [0], [0], [1], [0, 0, 1, 1], [], []>} : vector<8x32xbf16>, vector<32x128xbf16>, vector<8x128xf32> -> vector<8x128xf32>
    %105 = arith.addf %104, %81 : vector<8x128xf32>
    %106 = arith.mulf %105, %27 : vector<8x128xf32>
    %107 = arith.negf %106 : vector<8x128xf32>
    %108 = math.exp %107 : vector<8x128xf32>
    %cst_33 = arith.constant 1.000000e+00 : f32
    %109 = vector.broadcast %cst_33 : f32 to vector<8x128xf32>
    %110 = arith.addf %109, %108 : vector<8x128xf32>
    %111 = arith.divf %109, %110 : vector<8x128xf32>
    %112 = arith.mulf %111, %27 : vector<8x128xf32>
    %113 = arith.addf %112, %30 : vector<8x128xf32>
    %114 = vector.extract_strided_slice %113 {offsets = [0, 0], sizes = [8, 32], strides = [1, 1]} : vector<8x128xf32> to vector<8x32xf32>
    %115 = vector.extract_strided_slice %113 {offsets = [0, 32], sizes = [8, 32], strides = [1, 1]} : vector<8x128xf32> to vector<8x32xf32>
    %116 = vector.extract_strided_slice %113 {offsets = [0, 64], sizes = [8, 32], strides = [1, 1]} : vector<8x128xf32> to vector<8x32xf32>
    %117 = vector.extract_strided_slice %113 {offsets = [0, 96], sizes = [8, 32], strides = [1, 1]} : vector<8x128xf32> to vector<8x32xf32>
    %118 = arith.mulf %115, %76 : vector<8x32xf32>
    %119 = arith.mulf %114, %116 : vector<8x32xf32>
    %120 = arith.addf %118, %119 : vector<8x32xf32>
    %121 = math.tanh %120 : vector<8x32xf32>
    %122 = arith.mulf %117, %121 : vector<8x32xf32>
    %123 = arith.truncf %122 : vector<8x32xf32> to vector<8x32xbf16>
    %cst_34 = arith.constant dense<0.000000e+00> : vector<8x128xf32>
    %124 = tpu.matmul %123, %33, %cst_34 {dimension_numbers = #tpu.dot_dimension_numbers<[1], [0], [0], [1], [0, 0, 1, 1], [], []>} : vector<8x32xbf16>, vector<32x128xbf16>, vector<8x128xf32> -> vector<8x128xf32>
    %125 = arith.addf %124, %36 : vector<8x128xf32>
    %126 = vector.extract_strided_slice %18 {offsets = [16, 0], sizes = [8, 128], strides = [1, 1]} : vector<64x128xf32> to vector<8x128xf32>
    %127 = arith.truncf %102 : vector<8x32xf32> to vector<8x32xbf16>
    %cst_35 = arith.constant dense<0.000000e+00> : vector<8x128xf32>
    %128 = tpu.matmul %127, %31, %cst_35 {dimension_numbers = #tpu.dot_dimension_numbers<[1], [0], [0], [1], [0, 0, 1, 1], [], []>} : vector<8x32xbf16>, vector<32x128xbf16>, vector<8x128xf32> -> vector<8x128xf32>
    %129 = arith.addf %126, %128 : vector<8x128xf32>
    %130 = arith.mulf %129, %27 : vector<8x128xf32>
    %131 = arith.negf %130 : vector<8x128xf32>
    %132 = math.exp %131 : vector<8x128xf32>
    %cst_36 = arith.constant 1.000000e+00 : f32
    %133 = vector.broadcast %cst_36 : f32 to vector<8x128xf32>
    %134 = arith.addf %133, %132 : vector<8x128xf32>
    %135 = arith.divf %133, %134 : vector<8x128xf32>
    %136 = arith.mulf %135, %27 : vector<8x128xf32>
    %137 = arith.addf %136, %30 : vector<8x128xf32>
    %138 = vector.extract_strided_slice %137 {offsets = [0, 0], sizes = [8, 32], strides = [1, 1]} : vector<8x128xf32> to vector<8x32xf32>
    %139 = vector.extract_strided_slice %137 {offsets = [0, 32], sizes = [8, 32], strides = [1, 1]} : vector<8x128xf32> to vector<8x32xf32>
    %140 = vector.extract_strided_slice %137 {offsets = [0, 64], sizes = [8, 32], strides = [1, 1]} : vector<8x128xf32> to vector<8x32xf32>
    %141 = vector.extract_strided_slice %137 {offsets = [0, 96], sizes = [8, 32], strides = [1, 1]} : vector<8x128xf32> to vector<8x32xf32>
    %142 = arith.mulf %139, %100 : vector<8x32xf32>
    %143 = arith.mulf %138, %140 : vector<8x32xf32>
    %144 = arith.addf %142, %143 : vector<8x32xf32>
    %145 = math.tanh %144 : vector<8x32xf32>
    %146 = arith.mulf %141, %145 : vector<8x32xf32>
    %147 = arith.truncf %146 : vector<8x32xf32> to vector<8x32xbf16>
    %cst_37 = arith.constant dense<0.000000e+00> : vector<8x128xf32>
    %148 = tpu.matmul %147, %32, %cst_37 {dimension_numbers = #tpu.dot_dimension_numbers<[1], [0], [0], [1], [0, 0, 1, 1], [], []>} : vector<8x32xbf16>, vector<32x128xbf16>, vector<8x128xf32> -> vector<8x128xf32>
    %149 = arith.addf %148, %125 : vector<8x128xf32>
    %150 = arith.mulf %149, %27 : vector<8x128xf32>
    %151 = arith.negf %150 : vector<8x128xf32>
    %152 = math.exp %151 : vector<8x128xf32>
    %cst_38 = arith.constant 1.000000e+00 : f32
    %153 = vector.broadcast %cst_38 : f32 to vector<8x128xf32>
    %154 = arith.addf %153, %152 : vector<8x128xf32>
    %155 = arith.divf %153, %154 : vector<8x128xf32>
    %156 = arith.mulf %155, %27 : vector<8x128xf32>
    %157 = arith.addf %156, %30 : vector<8x128xf32>
    %158 = vector.extract_strided_slice %157 {offsets = [0, 0], sizes = [8, 32], strides = [1, 1]} : vector<8x128xf32> to vector<8x32xf32>
    %159 = vector.extract_strided_slice %157 {offsets = [0, 32], sizes = [8, 32], strides = [1, 1]} : vector<8x128xf32> to vector<8x32xf32>
    %160 = vector.extract_strided_slice %157 {offsets = [0, 64], sizes = [8, 32], strides = [1, 1]} : vector<8x128xf32> to vector<8x32xf32>
    %161 = vector.extract_strided_slice %157 {offsets = [0, 96], sizes = [8, 32], strides = [1, 1]} : vector<8x128xf32> to vector<8x32xf32>
    %162 = arith.mulf %159, %120 : vector<8x32xf32>
    %163 = arith.mulf %158, %160 : vector<8x32xf32>
    %164 = arith.addf %162, %163 : vector<8x32xf32>
    %165 = math.tanh %164 : vector<8x32xf32>
    %166 = arith.mulf %161, %165 : vector<8x32xf32>
    %167 = arith.truncf %166 : vector<8x32xf32> to vector<8x32xbf16>
    %cst_39 = arith.constant dense<0.000000e+00> : vector<8x128xf32>
    %168 = tpu.matmul %167, %33, %cst_39 {dimension_numbers = #tpu.dot_dimension_numbers<[1], [0], [0], [1], [0, 0, 1, 1], [], []>} : vector<8x32xbf16>, vector<32x128xbf16>, vector<8x128xf32> -> vector<8x128xf32>
    %169 = arith.addf %168, %36 : vector<8x128xf32>
    %170 = vector.extract_strided_slice %18 {offsets = [24, 0], sizes = [8, 128], strides = [1, 1]} : vector<64x128xf32> to vector<8x128xf32>
    %171 = arith.truncf %146 : vector<8x32xf32> to vector<8x32xbf16>
    %cst_40 = arith.constant dense<0.000000e+00> : vector<8x128xf32>
    %172 = tpu.matmul %171, %31, %cst_40 {dimension_numbers = #tpu.dot_dimension_numbers<[1], [0], [0], [1], [0, 0, 1, 1], [], []>} : vector<8x32xbf16>, vector<32x128xbf16>, vector<8x128xf32> -> vector<8x128xf32>
    %173 = arith.addf %170, %172 : vector<8x128xf32>
    %174 = arith.mulf %173, %27 : vector<8x128xf32>
    %175 = arith.negf %174 : vector<8x128xf32>
    %176 = math.exp %175 : vector<8x128xf32>
    %cst_41 = arith.constant 1.000000e+00 : f32
    %177 = vector.broadcast %cst_41 : f32 to vector<8x128xf32>
    %178 = arith.addf %177, %176 : vector<8x128xf32>
    %179 = arith.divf %177, %178 : vector<8x128xf32>
    %180 = arith.mulf %179, %27 : vector<8x128xf32>
    %181 = arith.addf %180, %30 : vector<8x128xf32>
    %182 = vector.extract_strided_slice %181 {offsets = [0, 0], sizes = [8, 32], strides = [1, 1]} : vector<8x128xf32> to vector<8x32xf32>
    %183 = vector.extract_strided_slice %181 {offsets = [0, 32], sizes = [8, 32], strides = [1, 1]} : vector<8x128xf32> to vector<8x32xf32>
    %184 = vector.extract_strided_slice %181 {offsets = [0, 64], sizes = [8, 32], strides = [1, 1]} : vector<8x128xf32> to vector<8x32xf32>
    %185 = vector.extract_strided_slice %181 {offsets = [0, 96], sizes = [8, 32], strides = [1, 1]} : vector<8x128xf32> to vector<8x32xf32>
    %186 = arith.mulf %183, %144 : vector<8x32xf32>
    %187 = arith.mulf %182, %184 : vector<8x32xf32>
    %188 = arith.addf %186, %187 : vector<8x32xf32>
    %189 = math.tanh %188 : vector<8x32xf32>
    %190 = arith.mulf %185, %189 : vector<8x32xf32>
    %191 = arith.truncf %190 : vector<8x32xf32> to vector<8x32xbf16>
    %cst_42 = arith.constant dense<0.000000e+00> : vector<8x128xf32>
    %192 = tpu.matmul %191, %32, %cst_42 {dimension_numbers = #tpu.dot_dimension_numbers<[1], [0], [0], [1], [0, 0, 1, 1], [], []>} : vector<8x32xbf16>, vector<32x128xbf16>, vector<8x128xf32> -> vector<8x128xf32>
    %193 = arith.addf %192, %169 : vector<8x128xf32>
    %194 = arith.mulf %193, %27 : vector<8x128xf32>
    %195 = arith.negf %194 : vector<8x128xf32>
    %196 = math.exp %195 : vector<8x128xf32>
    %cst_43 = arith.constant 1.000000e+00 : f32
    %197 = vector.broadcast %cst_43 : f32 to vector<8x128xf32>
    %198 = arith.addf %197, %196 : vector<8x128xf32>
    %199 = arith.divf %197, %198 : vector<8x128xf32>
    %200 = arith.mulf %199, %27 : vector<8x128xf32>
    %201 = arith.addf %200, %30 : vector<8x128xf32>
    %202 = vector.extract_strided_slice %201 {offsets = [0, 0], sizes = [8, 32], strides = [1, 1]} : vector<8x128xf32> to vector<8x32xf32>
    %203 = vector.extract_strided_slice %201 {offsets = [0, 32], sizes = [8, 32], strides = [1, 1]} : vector<8x128xf32> to vector<8x32xf32>
    %204 = vector.extract_strided_slice %201 {offsets = [0, 64], sizes = [8, 32], strides = [1, 1]} : vector<8x128xf32> to vector<8x32xf32>
    %205 = vector.extract_strided_slice %201 {offsets = [0, 96], sizes = [8, 32], strides = [1, 1]} : vector<8x128xf32> to vector<8x32xf32>
    %206 = arith.mulf %203, %164 : vector<8x32xf32>
    %207 = arith.mulf %202, %204 : vector<8x32xf32>
    %208 = arith.addf %206, %207 : vector<8x32xf32>
    %209 = math.tanh %208 : vector<8x32xf32>
    %210 = arith.mulf %205, %209 : vector<8x32xf32>
    %211 = arith.truncf %210 : vector<8x32xf32> to vector<8x32xbf16>
    %cst_44 = arith.constant dense<0.000000e+00> : vector<8x128xf32>
    %212 = tpu.matmul %211, %33, %cst_44 {dimension_numbers = #tpu.dot_dimension_numbers<[1], [0], [0], [1], [0, 0, 1, 1], [], []>} : vector<8x32xbf16>, vector<32x128xbf16>, vector<8x128xf32> -> vector<8x128xf32>
    %213 = arith.addf %212, %36 : vector<8x128xf32>
    %214 = vector.extract_strided_slice %18 {offsets = [32, 0], sizes = [8, 128], strides = [1, 1]} : vector<64x128xf32> to vector<8x128xf32>
    %215 = arith.truncf %190 : vector<8x32xf32> to vector<8x32xbf16>
    %cst_45 = arith.constant dense<0.000000e+00> : vector<8x128xf32>
    %216 = tpu.matmul %215, %31, %cst_45 {dimension_numbers = #tpu.dot_dimension_numbers<[1], [0], [0], [1], [0, 0, 1, 1], [], []>} : vector<8x32xbf16>, vector<32x128xbf16>, vector<8x128xf32> -> vector<8x128xf32>
    %217 = arith.addf %214, %216 : vector<8x128xf32>
    %218 = arith.mulf %217, %27 : vector<8x128xf32>
    %219 = arith.negf %218 : vector<8x128xf32>
    %220 = math.exp %219 : vector<8x128xf32>
    %cst_46 = arith.constant 1.000000e+00 : f32
    %221 = vector.broadcast %cst_46 : f32 to vector<8x128xf32>
    %222 = arith.addf %221, %220 : vector<8x128xf32>
    %223 = arith.divf %221, %222 : vector<8x128xf32>
    %224 = arith.mulf %223, %27 : vector<8x128xf32>
    %225 = arith.addf %224, %30 : vector<8x128xf32>
    %226 = vector.extract_strided_slice %225 {offsets = [0, 0], sizes = [8, 32], strides = [1, 1]} : vector<8x128xf32> to vector<8x32xf32>
    %227 = vector.extract_strided_slice %225 {offsets = [0, 32], sizes = [8, 32], strides = [1, 1]} : vector<8x128xf32> to vector<8x32xf32>
    %228 = vector.extract_strided_slice %225 {offsets = [0, 64], sizes = [8, 32], strides = [1, 1]} : vector<8x128xf32> to vector<8x32xf32>
    %229 = vector.extract_strided_slice %225 {offsets = [0, 96], sizes = [8, 32], strides = [1, 1]} : vector<8x128xf32> to vector<8x32xf32>
    %230 = arith.mulf %227, %188 : vector<8x32xf32>
    %231 = arith.mulf %226, %228 : vector<8x32xf32>
    %232 = arith.addf %230, %231 : vector<8x32xf32>
    %233 = math.tanh %232 : vector<8x32xf32>
    %234 = arith.mulf %229, %233 : vector<8x32xf32>
    %235 = arith.truncf %234 : vector<8x32xf32> to vector<8x32xbf16>
    %cst_47 = arith.constant dense<0.000000e+00> : vector<8x128xf32>
    %236 = tpu.matmul %235, %32, %cst_47 {dimension_numbers = #tpu.dot_dimension_numbers<[1], [0], [0], [1], [0, 0, 1, 1], [], []>} : vector<8x32xbf16>, vector<32x128xbf16>, vector<8x128xf32> -> vector<8x128xf32>
    %237 = arith.addf %236, %213 : vector<8x128xf32>
    %238 = arith.mulf %237, %27 : vector<8x128xf32>
    %239 = arith.negf %238 : vector<8x128xf32>
    %240 = math.exp %239 : vector<8x128xf32>
    %cst_48 = arith.constant 1.000000e+00 : f32
    %241 = vector.broadcast %cst_48 : f32 to vector<8x128xf32>
    %242 = arith.addf %241, %240 : vector<8x128xf32>
    %243 = arith.divf %241, %242 : vector<8x128xf32>
    %244 = arith.mulf %243, %27 : vector<8x128xf32>
    %245 = arith.addf %244, %30 : vector<8x128xf32>
    %246 = vector.extract_strided_slice %245 {offsets = [0, 0], sizes = [8, 32], strides = [1, 1]} : vector<8x128xf32> to vector<8x32xf32>
    %247 = vector.extract_strided_slice %245 {offsets = [0, 32], sizes = [8, 32], strides = [1, 1]} : vector<8x128xf32> to vector<8x32xf32>
    %248 = vector.extract_strided_slice %245 {offsets = [0, 64], sizes = [8, 32], strides = [1, 1]} : vector<8x128xf32> to vector<8x32xf32>
    %249 = vector.extract_strided_slice %245 {offsets = [0, 96], sizes = [8, 32], strides = [1, 1]} : vector<8x128xf32> to vector<8x32xf32>
    %250 = arith.mulf %247, %208 : vector<8x32xf32>
    %251 = arith.mulf %246, %248 : vector<8x32xf32>
    %252 = arith.addf %250, %251 : vector<8x32xf32>
    %253 = math.tanh %252 : vector<8x32xf32>
    %254 = arith.mulf %249, %253 : vector<8x32xf32>
    %255 = arith.truncf %254 : vector<8x32xf32> to vector<8x32xbf16>
    %cst_49 = arith.constant dense<0.000000e+00> : vector<8x128xf32>
    %256 = tpu.matmul %255, %33, %cst_49 {dimension_numbers = #tpu.dot_dimension_numbers<[1], [0], [0], [1], [0, 0, 1, 1], [], []>} : vector<8x32xbf16>, vector<32x128xbf16>, vector<8x128xf32> -> vector<8x128xf32>
    %257 = arith.addf %256, %36 : vector<8x128xf32>
    %258 = vector.extract_strided_slice %18 {offsets = [40, 0], sizes = [8, 128], strides = [1, 1]} : vector<64x128xf32> to vector<8x128xf32>
    %259 = arith.truncf %234 : vector<8x32xf32> to vector<8x32xbf16>
    %cst_50 = arith.constant dense<0.000000e+00> : vector<8x128xf32>
    %260 = tpu.matmul %259, %31, %cst_50 {dimension_numbers = #tpu.dot_dimension_numbers<[1], [0], [0], [1], [0, 0, 1, 1], [], []>} : vector<8x32xbf16>, vector<32x128xbf16>, vector<8x128xf32> -> vector<8x128xf32>
    %261 = arith.addf %258, %260 : vector<8x128xf32>
    %262 = arith.mulf %261, %27 : vector<8x128xf32>
    %263 = arith.negf %262 : vector<8x128xf32>
    %264 = math.exp %263 : vector<8x128xf32>
    %cst_51 = arith.constant 1.000000e+00 : f32
    %265 = vector.broadcast %cst_51 : f32 to vector<8x128xf32>
    %266 = arith.addf %265, %264 : vector<8x128xf32>
    %267 = arith.divf %265, %266 : vector<8x128xf32>
    %268 = arith.mulf %267, %27 : vector<8x128xf32>
    %269 = arith.addf %268, %30 : vector<8x128xf32>
    %270 = vector.extract_strided_slice %269 {offsets = [0, 0], sizes = [8, 32], strides = [1, 1]} : vector<8x128xf32> to vector<8x32xf32>
    %271 = vector.extract_strided_slice %269 {offsets = [0, 32], sizes = [8, 32], strides = [1, 1]} : vector<8x128xf32> to vector<8x32xf32>
    %272 = vector.extract_strided_slice %269 {offsets = [0, 64], sizes = [8, 32], strides = [1, 1]} : vector<8x128xf32> to vector<8x32xf32>
    %273 = vector.extract_strided_slice %269 {offsets = [0, 96], sizes = [8, 32], strides = [1, 1]} : vector<8x128xf32> to vector<8x32xf32>
    %274 = arith.mulf %271, %232 : vector<8x32xf32>
    %275 = arith.mulf %270, %272 : vector<8x32xf32>
    %276 = arith.addf %274, %275 : vector<8x32xf32>
    %277 = math.tanh %276 : vector<8x32xf32>
    %278 = arith.mulf %273, %277 : vector<8x32xf32>
    %279 = arith.truncf %278 : vector<8x32xf32> to vector<8x32xbf16>
    %cst_52 = arith.constant dense<0.000000e+00> : vector<8x128xf32>
    %280 = tpu.matmul %279, %32, %cst_52 {dimension_numbers = #tpu.dot_dimension_numbers<[1], [0], [0], [1], [0, 0, 1, 1], [], []>} : vector<8x32xbf16>, vector<32x128xbf16>, vector<8x128xf32> -> vector<8x128xf32>
    %281 = arith.addf %280, %257 : vector<8x128xf32>
    %282 = arith.mulf %281, %27 : vector<8x128xf32>
    %283 = arith.negf %282 : vector<8x128xf32>
    %284 = math.exp %283 : vector<8x128xf32>
    %cst_53 = arith.constant 1.000000e+00 : f32
    %285 = vector.broadcast %cst_53 : f32 to vector<8x128xf32>
    %286 = arith.addf %285, %284 : vector<8x128xf32>
    %287 = arith.divf %285, %286 : vector<8x128xf32>
    %288 = arith.mulf %287, %27 : vector<8x128xf32>
    %289 = arith.addf %288, %30 : vector<8x128xf32>
    %290 = vector.extract_strided_slice %289 {offsets = [0, 0], sizes = [8, 32], strides = [1, 1]} : vector<8x128xf32> to vector<8x32xf32>
    %291 = vector.extract_strided_slice %289 {offsets = [0, 32], sizes = [8, 32], strides = [1, 1]} : vector<8x128xf32> to vector<8x32xf32>
    %292 = vector.extract_strided_slice %289 {offsets = [0, 64], sizes = [8, 32], strides = [1, 1]} : vector<8x128xf32> to vector<8x32xf32>
    %293 = vector.extract_strided_slice %289 {offsets = [0, 96], sizes = [8, 32], strides = [1, 1]} : vector<8x128xf32> to vector<8x32xf32>
    %294 = arith.mulf %291, %252 : vector<8x32xf32>
    %295 = arith.mulf %290, %292 : vector<8x32xf32>
    %296 = arith.addf %294, %295 : vector<8x32xf32>
    %297 = math.tanh %296 : vector<8x32xf32>
    %298 = arith.mulf %293, %297 : vector<8x32xf32>
    %299 = arith.truncf %298 : vector<8x32xf32> to vector<8x32xbf16>
    %cst_54 = arith.constant dense<0.000000e+00> : vector<8x128xf32>
    %300 = tpu.matmul %299, %33, %cst_54 {dimension_numbers = #tpu.dot_dimension_numbers<[1], [0], [0], [1], [0, 0, 1, 1], [], []>} : vector<8x32xbf16>, vector<32x128xbf16>, vector<8x128xf32> -> vector<8x128xf32>
    %301 = arith.addf %300, %36 : vector<8x128xf32>
    %302 = vector.extract_strided_slice %18 {offsets = [48, 0], sizes = [8, 128], strides = [1, 1]} : vector<64x128xf32> to vector<8x128xf32>
    %303 = arith.truncf %278 : vector<8x32xf32> to vector<8x32xbf16>
    %cst_55 = arith.constant dense<0.000000e+00> : vector<8x128xf32>
    %304 = tpu.matmul %303, %31, %cst_55 {dimension_numbers = #tpu.dot_dimension_numbers<[1], [0], [0], [1], [0, 0, 1, 1], [], []>} : vector<8x32xbf16>, vector<32x128xbf16>, vector<8x128xf32> -> vector<8x128xf32>
    %305 = arith.addf %302, %304 : vector<8x128xf32>
    %306 = arith.mulf %305, %27 : vector<8x128xf32>
    %307 = arith.negf %306 : vector<8x128xf32>
    %308 = math.exp %307 : vector<8x128xf32>
    %cst_56 = arith.constant 1.000000e+00 : f32
    %309 = vector.broadcast %cst_56 : f32 to vector<8x128xf32>
    %310 = arith.addf %309, %308 : vector<8x128xf32>
    %311 = arith.divf %309, %310 : vector<8x128xf32>
    %312 = arith.mulf %311, %27 : vector<8x128xf32>
    %313 = arith.addf %312, %30 : vector<8x128xf32>
    %314 = vector.extract_strided_slice %313 {offsets = [0, 0], sizes = [8, 32], strides = [1, 1]} : vector<8x128xf32> to vector<8x32xf32>
    %315 = vector.extract_strided_slice %313 {offsets = [0, 32], sizes = [8, 32], strides = [1, 1]} : vector<8x128xf32> to vector<8x32xf32>
    %316 = vector.extract_strided_slice %313 {offsets = [0, 64], sizes = [8, 32], strides = [1, 1]} : vector<8x128xf32> to vector<8x32xf32>
    %317 = vector.extract_strided_slice %313 {offsets = [0, 96], sizes = [8, 32], strides = [1, 1]} : vector<8x128xf32> to vector<8x32xf32>
    %318 = arith.mulf %315, %276 : vector<8x32xf32>
    %319 = arith.mulf %314, %316 : vector<8x32xf32>
    %320 = arith.addf %318, %319 : vector<8x32xf32>
    %321 = math.tanh %320 : vector<8x32xf32>
    %322 = arith.mulf %317, %321 : vector<8x32xf32>
    %323 = arith.truncf %322 : vector<8x32xf32> to vector<8x32xbf16>
    %cst_57 = arith.constant dense<0.000000e+00> : vector<8x128xf32>
    %324 = tpu.matmul %323, %32, %cst_57 {dimension_numbers = #tpu.dot_dimension_numbers<[1], [0], [0], [1], [0, 0, 1, 1], [], []>} : vector<8x32xbf16>, vector<32x128xbf16>, vector<8x128xf32> -> vector<8x128xf32>
    %325 = arith.addf %324, %301 : vector<8x128xf32>
    %326 = arith.mulf %325, %27 : vector<8x128xf32>
    %327 = arith.negf %326 : vector<8x128xf32>
    %328 = math.exp %327 : vector<8x128xf32>
    %cst_58 = arith.constant 1.000000e+00 : f32
    %329 = vector.broadcast %cst_58 : f32 to vector<8x128xf32>
    %330 = arith.addf %329, %328 : vector<8x128xf32>
    %331 = arith.divf %329, %330 : vector<8x128xf32>
    %332 = arith.mulf %331, %27 : vector<8x128xf32>
    %333 = arith.addf %332, %30 : vector<8x128xf32>
    %334 = vector.extract_strided_slice %333 {offsets = [0, 0], sizes = [8, 32], strides = [1, 1]} : vector<8x128xf32> to vector<8x32xf32>
    %335 = vector.extract_strided_slice %333 {offsets = [0, 32], sizes = [8, 32], strides = [1, 1]} : vector<8x128xf32> to vector<8x32xf32>
    %336 = vector.extract_strided_slice %333 {offsets = [0, 64], sizes = [8, 32], strides = [1, 1]} : vector<8x128xf32> to vector<8x32xf32>
    %337 = vector.extract_strided_slice %333 {offsets = [0, 96], sizes = [8, 32], strides = [1, 1]} : vector<8x128xf32> to vector<8x32xf32>
    %338 = arith.mulf %335, %296 : vector<8x32xf32>
    %339 = arith.mulf %334, %336 : vector<8x32xf32>
    %340 = arith.addf %338, %339 : vector<8x32xf32>
    %341 = math.tanh %340 : vector<8x32xf32>
    %342 = arith.mulf %337, %341 : vector<8x32xf32>
    %343 = arith.truncf %342 : vector<8x32xf32> to vector<8x32xbf16>
    %cst_59 = arith.constant dense<0.000000e+00> : vector<8x128xf32>
    %344 = tpu.matmul %343, %33, %cst_59 {dimension_numbers = #tpu.dot_dimension_numbers<[1], [0], [0], [1], [0, 0, 1, 1], [], []>} : vector<8x32xbf16>, vector<32x128xbf16>, vector<8x128xf32> -> vector<8x128xf32>
    %345 = arith.addf %344, %36 : vector<8x128xf32>
    %346 = vector.extract_strided_slice %18 {offsets = [56, 0], sizes = [8, 128], strides = [1, 1]} : vector<64x128xf32> to vector<8x128xf32>
    %347 = arith.truncf %322 : vector<8x32xf32> to vector<8x32xbf16>
    %cst_60 = arith.constant dense<0.000000e+00> : vector<8x128xf32>
    %348 = tpu.matmul %347, %31, %cst_60 {dimension_numbers = #tpu.dot_dimension_numbers<[1], [0], [0], [1], [0, 0, 1, 1], [], []>} : vector<8x32xbf16>, vector<32x128xbf16>, vector<8x128xf32> -> vector<8x128xf32>
    %349 = arith.addf %346, %348 : vector<8x128xf32>
    %350 = arith.mulf %349, %27 : vector<8x128xf32>
    %351 = arith.negf %350 : vector<8x128xf32>
    %352 = math.exp %351 : vector<8x128xf32>
    %cst_61 = arith.constant 1.000000e+00 : f32
    %353 = vector.broadcast %cst_61 : f32 to vector<8x128xf32>
    %354 = arith.addf %353, %352 : vector<8x128xf32>
    %355 = arith.divf %353, %354 : vector<8x128xf32>
    %356 = arith.mulf %355, %27 : vector<8x128xf32>
    %357 = arith.addf %356, %30 : vector<8x128xf32>
    %358 = vector.extract_strided_slice %357 {offsets = [0, 0], sizes = [8, 32], strides = [1, 1]} : vector<8x128xf32> to vector<8x32xf32>
    %359 = vector.extract_strided_slice %357 {offsets = [0, 32], sizes = [8, 32], strides = [1, 1]} : vector<8x128xf32> to vector<8x32xf32>
    %360 = vector.extract_strided_slice %357 {offsets = [0, 64], sizes = [8, 32], strides = [1, 1]} : vector<8x128xf32> to vector<8x32xf32>
    %361 = vector.extract_strided_slice %357 {offsets = [0, 96], sizes = [8, 32], strides = [1, 1]} : vector<8x128xf32> to vector<8x32xf32>
    %362 = arith.mulf %359, %320 : vector<8x32xf32>
    %363 = arith.mulf %358, %360 : vector<8x32xf32>
    %364 = arith.addf %362, %363 : vector<8x32xf32>
    %365 = math.tanh %364 : vector<8x32xf32>
    %366 = arith.mulf %361, %365 : vector<8x32xf32>
    %367 = arith.truncf %366 : vector<8x32xf32> to vector<8x32xbf16>
    %cst_62 = arith.constant dense<0.000000e+00> : vector<8x128xf32>
    %368 = tpu.matmul %367, %32, %cst_62 {dimension_numbers = #tpu.dot_dimension_numbers<[1], [0], [0], [1], [0, 0, 1, 1], [], []>} : vector<8x32xbf16>, vector<32x128xbf16>, vector<8x128xf32> -> vector<8x128xf32>
    %369 = arith.addf %368, %345 : vector<8x128xf32>
    %370 = arith.mulf %369, %27 : vector<8x128xf32>
    %371 = arith.negf %370 : vector<8x128xf32>
    %372 = math.exp %371 : vector<8x128xf32>
    %cst_63 = arith.constant 1.000000e+00 : f32
    %373 = vector.broadcast %cst_63 : f32 to vector<8x128xf32>
    %374 = arith.addf %373, %372 : vector<8x128xf32>
    %375 = arith.divf %373, %374 : vector<8x128xf32>
    %376 = arith.mulf %375, %27 : vector<8x128xf32>
    %377 = arith.addf %376, %30 : vector<8x128xf32>
    %378 = vector.extract_strided_slice %377 {offsets = [0, 0], sizes = [8, 32], strides = [1, 1]} : vector<8x128xf32> to vector<8x32xf32>
    %379 = vector.extract_strided_slice %377 {offsets = [0, 32], sizes = [8, 32], strides = [1, 1]} : vector<8x128xf32> to vector<8x32xf32>
    %380 = vector.extract_strided_slice %377 {offsets = [0, 64], sizes = [8, 32], strides = [1, 1]} : vector<8x128xf32> to vector<8x32xf32>
    %381 = vector.extract_strided_slice %377 {offsets = [0, 96], sizes = [8, 32], strides = [1, 1]} : vector<8x128xf32> to vector<8x32xf32>
    %382 = arith.mulf %379, %340 : vector<8x32xf32>
    %383 = arith.mulf %378, %380 : vector<8x32xf32>
    %384 = arith.addf %382, %383 : vector<8x32xf32>
    %385 = math.tanh %384 : vector<8x32xf32>
    %386 = arith.mulf %381, %385 : vector<8x32xf32>
    %387 = tpu.concatenate %78, %122, %166, %210, %254, %298, %342, %386 in 0 : vector<8x32xf32>, vector<8x32xf32>, vector<8x32xf32>, vector<8x32xf32>, vector<8x32xf32>, vector<8x32xf32>, vector<8x32xf32>, vector<8x32xf32> -> vector<64x32xf32>
    %388 = arith.truncf %387 : vector<64x32xf32> to vector<64x32xbf16>
    %c0_64 = arith.constant 0 : index
    %c0_65 = arith.constant 0 : index
    %389 = vector.load %arg9[%c0_64, %c0_65] : memref<32x128xbf16, #tpu.memory_space<vmem>>, vector<32x128xbf16>
    %cst_66 = arith.constant dense<0.000000e+00> : vector<64x128xf32>
    %390 = tpu.matmul %388, %389, %cst_66 {dimension_numbers = #tpu.dot_dimension_numbers<[1], [0], [0], [1], [0, 0, 1, 1], [], []>} : vector<64x32xbf16>, vector<32x128xbf16>, vector<64x128xf32> -> vector<64x128xf32>
    %c0_67 = arith.constant 0 : index
    %c0_68 = arith.constant 0 : index
    %391 = vector.load %arg10[%c0_67, %c0_68] : memref<1x128xf32, #tpu.memory_space<vmem>>, vector<1x128xf32>
    %392 = vector.broadcast %391 : vector<1x128xf32> to vector<64x128xf32>
    %393 = arith.addf %390, %392 : vector<64x128xf32>
    %c0_69 = arith.constant 0 : index
    %c0_70 = arith.constant 0 : index
    %394 = vector.load %arg11[%c0_69, %c0_70] : memref<64x128xf32, #tpu.memory_space<vmem>>, vector<64x128xf32>
    tpu.vector_store %arg11[%c0_69, %c0_70], %393 {strides = array<i32>} : memref<64x128xf32, #tpu.memory_space<vmem>>, vector<64x128xf32>,
    %395 = tpu.concatenate %366, %386, %364, %384 in 1 : vector<8x32xf32>, vector<8x32xf32>, vector<8x32xf32>, vector<8x32xf32> -> vector<8x128xf32>
    %c0_71 = arith.constant 0 : index
    %c0_72 = arith.constant 0 : index
    %396 = vector.load %arg12[%c0_71, %c0_72] : memref<8x128xf32, #tpu.memory_space<vmem>>, vector<8x128xf32>
    tpu.vector_store %arg12[%c0_71, %c0_72], %395 {strides = array<i32>} : memref<8x128xf32, #tpu.memory_space<vmem>>, vector<8x128xf32>,
    return
  }
}

</mosaic_0001>

<bundles_post_ra>
// kernel: tpu_custom_call.1
= control target key start
LH: loop header
LB: loop body
LE: loop exit
PB: predicated region body
PF: predicated region fallthrough
CT: control target
= control target key end

     0   :  { %18 = vsyncpa [#allocation3], 0  ;;  %s4800_s0 = inlined_call_operand.vmem [shape: f32[64,512], index: 0, kind: input, shape index: {}]   ;;  %s4801_s1 = inlined_call_operand.vmem [shape: bf16[512,8], index: 1, kind: input, shape index: {}]   ;;  %s4802_s2 = inlined_call_operand.vmem [shape: bf16[8,512], index: 2, kind: input, shape index: {}]   ;;  %s4803_s3 = inlined_call_operand.hbm [shape: bf16[512,128], index: 3, kind: input, shape index: {}]   ;;  %s4804_s4 = inlined_call_operand.hbm [shape: bf16[32,128], index: 4, kind: input, shape index: {}]   ;;  %s4805_s5 = inlined_call_operand.vmem [shape: f32[1,128], index: 5, kind: input, shape index: {}]   ;;  %s4806_s6 = inlined_call_operand.vmem [shape: bf16[32,128], index: 6, kind: input, shape index: {}]   ;;  %s4807_s7 = inlined_call_operand.hbm [shape: bf16[32,128], index: 7, kind: input, shape index: {}]   ;;  %s4808_s8 = inlined_call_operand.vmem [shape: f32[1,128], index: 8, kind: input, shape index: {}]   ;;  %s4809_s9 = inlined_call_operand.vmem [shape: bf16[32,128], index: 9, kind: input, shape index: {}]   ;;  %s4810_s10 = inlined_call_operand.vmem [shape: f32[1,128], index: 10, kind: input, shape index: {}]   ;;  %s4811_s11 = inlined_call_operand.hbm [shape: f32[64,128], index: 11, kind: output, shape index: {0}]   ;;  %s4812_s12 = inlined_call_operand.hbm [shape: f32[8,128], index: 12, kind: output, shape index: {1}]  }
   0x1   :  { %19 = vsyncpa [#allocation6], 0 }
   0x2   :  { %20 = vsyncpa [#allocation4], 0 }
   0x3   :  { %21 = vsyncpa [#allocation10], 0  ;;  %s3834_s21 = smov [#allocation5]   ;;  %s3835_s23 = smov [#allocation2]  }
   0x4   :  { %s45_s22 = sshll.u32 %s3834_s21, 4  ;;  %s33_s24 = sshll.u32 %s3835_s23, 4  ;;  %s46_s22 = int_to_ptr.vmem [resolvable:$true] %s45_s22  ;;  %s3913_s24 = int_to_ptr.vmem [resolvable:$true] %s33_s24 }
   0x5   :  { %s3716_s27 = scalar_lea.hbm %s4804_s4, 256 }
   0x6   :  { %p3717_p0 = scmp.ne.s32.totalorder %s4804_s4, %s3716_s27  ;;  %p3720_p1 = scmp.lt.u32.totalorder %s3716_s27, %s4804_s4 }
   0x8   :  { %p3722_p2 = pnand %p3720_p1, %p3717_p0 }
   0xa   :  { %3725 = shalt.err (!%p3722_p2)
}
   0xb   :  { %s3726_s14 = scalar_lea.vmem %s46_s22, 256  ;;  %p3731_p4 = scmp.lt.s32.totalorder %s46_s22, %s46_s22 }
   0xc   :  { %p3727_p3 = scmp.ne.s32.totalorder %s46_s22, %s3726_s14  ;;  %p3732_p5 = scmp.lt.s32.totalorder %s3726_s14, %s3726_s14 }
   0xe   :  { %p3733_p6 = por %p3732_p5, %p3731_p4 }
  0x10   :  { %p3734_p7 = pnand %p3733_p6, %p3727_p3 }
  0x12   :  { %3737 = shalt.err (!%p3734_p7)
}
  0x13   :  { %s3836_s15 = smov 64   ;;  %s3837_s16 = smov 4  }
  0x14   :  { %51 = dma.hbm_to_vmem [thread:$0]  %s4804_s4, 256, %s46_s22, [#allocation6], %s3836_s15, %s3836_s15, %s3837_s16  }
  0x15   :  { %s3738_s21 = scalar_lea.hbm %s4803_s3, 4096 }
  0x16   :  { %p3739_p8 = scmp.ne.s32.totalorder %s4803_s3, %s3738_s21  ;;  %p3742_p9 = scmp.lt.u32.totalorder %s3738_s21, %s4803_s3 }
  0x18   :  { %p3744_p10 = pnand %p3742_p9, %p3739_p8 }
  0x1a   :  { %3747 = shalt.err (!%p3744_p10)
}
  0x1b   :  { %s3748_s28 = scalar_lea.vmem %s3913_s24, 4096  ;;  %p3753_p12 = scmp.lt.s32.totalorder %s3913_s24, %s3913_s24 }
  0x1c   :  { %p3749_p11 = scmp.ne.s32.totalorder %s3913_s24, %s3748_s28  ;;  %p3754_p13 = scmp.lt.s32.totalorder %s3748_s28, %s3748_s28 }
  0x1e   :  { %p3755_p0 = por %p3754_p13, %p3753_p12 }
  0x20   :  { %p3756_p1 = pnand %p3755_p0, %p3749_p11 }
  0x22   :  { %3759 = shalt.err (!%p3756_p1)
}
  0x23   :  { %39 = dma.hbm_to_vmem [thread:$0]  %s4803_s3, 4096, %s3913_s24, [#allocation3], %s3836_s15, %s3836_s15, %s3837_s16  }
  0x24   :  { %s3838_s29 = smov [#allocation7]   ;;  %s3760_s17 = scalar_lea.hbm %s4807_s7, 256 }
  0x25   :  { %s61_s30 = sshll.u32 %s3838_s29, 4  ;;  %p3761_p2 = scmp.ne.s32.totalorder %s4807_s7, %s3760_s17  ;;  %s62_s30 = int_to_ptr.vmem [resolvable:$true] %s61_s30 }
  0x26   :  { %p3764_p3 = scmp.lt.u32.totalorder %s3760_s17, %s4807_s7 }
  0x28   :  { %p3766_p4 = pnand %p3764_p3, %p3761_p2 }
  0x2a   :  { %3769 = shalt.err (!%p3766_p4)
}
  0x2b   :  { %s3770_s23 = scalar_lea.vmem %s62_s30, 256  ;;  %p3775_p6 = scmp.lt.s32.totalorder %s62_s30, %s62_s30 }
  0x2c   :  { %p3771_p5 = scmp.ne.s32.totalorder %s62_s30, %s3770_s23  ;;  %p3776_p7 = scmp.lt.s32.totalorder %s3770_s23, %s3770_s23 }
  0x2e   :  { %p3777_p8 = por %p3776_p7, %p3775_p6 }
  0x30   :  { %p3778_p9 = pnand %p3777_p8, %p3771_p5 }
  0x32   :  { %3781 = shalt.err (!%p3778_p9)
}
  0x33   :  { %67 = dma.hbm_to_vmem [thread:$0]  %s4807_s7, 256, %s62_s30, [#allocation6], %s3836_s15, %s3836_s15, %s3837_s16  }
  0x34   :  { %3826 = dma.done.wait [#allocation3], 4096  }
  0x35   :  { %3827 = vsyncadd [#allocation3], 4294963200 }
  0x36   :  { %3828 = dma.done.wait [#allocation6], 512  }
  0x37   :  { %3829 = vsyncadd [#allocation6], 4294966784  ;;  %v3507_v0 = vld [vmem:[%s4801_s1 + $0x40] sm:$0xff]   ;;  %v3511_v4 = vld [vmem:[%s4801_s1 + $0x48] sm:$0xff]   ;;  %vm595_vm0 = vcmask 1043456   ;;  %vm582_vm1 = vcmask 64512  }
  0x38   :  { %v3508_v1 = vld [vmem:[%s4801_s1 + $0xc0] sm:$0xff]   ;;  %3027 = vmatprep.subr.bf16.mxu0 %v3507_v0  ;;  %v3512_v5 = vld [vmem:[%s4801_s1 + $0xc8] sm:$0xff]   ;;  %v3515_v8 = vld [vmem:[%s4801_s1 + $0x50] sm:$0xff]   ;;  %vm3841_vm2 = vmmov 0   ;;  %vm1233_vm6 = vcmask 261120   ;;  %vm2851_vm7 = vcmask 523264  }
  0x39   :  { %v3509_v2 = vld [vmem:[%s4801_s1] sm:$0xff]   ;;  %3067 = vmatprep.subr.bf16.mxu1 %v3508_v1  ;;  %v3513_v6 = vld [vmem:[%s4801_s1 + $0x8] sm:$0xff]   ;;  %v3516_v9 = vld [vmem:[%s4801_s1 + $0xd0] sm:$0xff]   ;;  %vm2853_vm8 = vcmask 785408  }
  0x3a   :  { %v3510_v3 = vld [vmem:[%s4801_s1 + $0x80] sm:$0xff]   ;;  %3028 = vmatpush3.bf16.msra.mxu0 %v3509_v2  ;;  %v3514_v7 = vld [vmem:[%s4801_s1 + $0x88] sm:$0xff]   ;;  %v3517_v10 = vld [vmem:[%s4801_s1 + $0x10] sm:$0xff]  }
  0x3b   :  { %3068 = vmatpush3.bf16.msra.mxu1 %v3510_v3  ;;  %3029 = vmatprep.subr.bf16.mxu0 %v3511_v4  ;;  %v3518_v11 = vld [vmem:[%s4801_s1 + $0x90] sm:$0xff]   ;;  %v3519_v12 = vld [vmem:[%s4801_s1 + $0x58] sm:$0xff]   ;;  %v3523_v16 = vld [vmem:[%s4801_s1 + $0x60] sm:$0xff]  }
  0x3c   :  { %3069 = vmatprep.subr.bf16.mxu1 %v3512_v5  ;;  %v3520_v13 = vld [vmem:[%s4801_s1 + $0xd8] sm:$0xff]   ;;  %v3524_v17 = vld [vmem:[%s4801_s1 + $0xe0] sm:$0xff]   ;;  %v3527_v20 = vld [vmem:[%s4801_s1 + $0x68] sm:$0xff]  }
  0x3d   :  { %v3521_v14 = vld [vmem:[%s4801_s1 + $0x18] sm:$0xff]   ;;  %v3525_v18 = vld [vmem:[%s4801_s1 + $0x20] sm:$0xff]   ;;  %v3528_v21 = vld [vmem:[%s4801_s1 + $0xe8] sm:$0xff]  }
  0x3e   :  { %3030 = vmatpush3.bf16.msra.mxu0 %v3513_v6  ;;  %v3522_v15 = vld [vmem:[%s4801_s1 + $0x98] sm:$0xff]   ;;  %v3526_v19 = vld [vmem:[%s4801_s1 + $0xa0] sm:$0xff]   ;;  %v3529_v22 = vld [vmem:[%s4801_s1 + $0x28] sm:$0xff]  }
  0x3f   :  { %3070 = vmatpush3.bf16.msra.mxu1 %v3514_v7  ;;  %3031 = vmatprep.subr.bf16.mxu0 %v3515_v8  ;;  %v3530_v23 = vld [vmem:[%s4801_s1 + $0xa8] sm:$0xff]   ;;  %v3531_v24 = vld [vmem:[%s4801_s1 + $0x70] sm:$0xff]   ;;  %v3535_v28 = vld [vmem:[%s4801_s1 + $0x78] sm:$0xff]  }
  0x40   :  { %3071 = vmatprep.subr.bf16.mxu1 %v3516_v9  ;;  %v3532_v25 = vld [vmem:[%s4801_s1 + $0xf0] sm:$0xff]   ;;  %v3536_v29 = vld [vmem:[%s4801_s1 + $0xf8] sm:$0xff]   ;;  %v4064_v32 = vld [vmem:[%s4800_s0 + $0x8] sm:$0xff] }
  0x41   :  { %v3533_v26 = vld [vmem:[%s4801_s1 + $0x30] sm:$0xff]   ;;  %v3537_v30 = vld [vmem:[%s4801_s1 + $0x38] sm:$0xff]   ;;  %v4069_v33 = vld [vmem:[%s4800_s0 + $0x28] sm:$0xff] }
  0x42   :  { %3032 = vmatpush3.bf16.msra.mxu0 %v3517_v10  ;;  %v3534_v27 = vld [vmem:[%s4801_s1 + $0xb0] sm:$0xff]   ;;  %v3538_v31 = vld [vmem:[%s4801_s1 + $0xb8] sm:$0xff]   ;;  %v117_v35 = vpack.c.bf16 %v4069_v33, %v4064_v32  ;;  %v4086_v37 = vld [vmem:[%s4800_s0] sm:$0xff] }
  0x43   :  { %3072 = vmatpush3.bf16.msra.mxu1 %v3518_v11  ;;  %3033 = vmatprep.subr.bf16.mxu0 %v3519_v12  ;;  %v4074_v34 = vld [vmem:[%s4800_s0 + $0x18] sm:$0xff]  ;;  %v4091_v38 = vld [vmem:[%s4800_s0 + $0x20] sm:$0xff]  ;;  %v4100_v41 = vld [vmem:[%s4800_s0 + $0x10] sm:$0xff] }
  0x44   :  { %3073 = vmatprep.subr.bf16.mxu1 %v3520_v13  ;;  %v4081_v36 = vld [vmem:[%s4800_s0 + $0x38] sm:$0xff]  ;;  %v116_v40 = vpack.c.bf16 %v4091_v38, %v4086_v37  ;;  %v4105_v42 = vld [vmem:[%s4800_s0 + $0x30] sm:$0xff]  ;;  %v4110_v43 = vld [vmem:[%s4800_s0 + $0x48] sm:$0xff]  ;;  %420 = vmatprep.mubr.bf16.mxu0 %v117_v35 }
  0x45   :  { %v119_v39 = vpack.c.bf16 %v4081_v36, %v4074_v34  ;;  %v118_v44 = vpack.c.bf16 %v4105_v42, %v4100_v41  ;;  %v4117_v45 = vld [vmem:[%s4800_s0 + $0x68] sm:$0xff]  ;;  %v4122_v46 = vld [vmem:[%s4800_s0 + $0x58] sm:$0xff]  ;;  %v4136_v50 = vld [vmem:[%s4800_s0 + $0x40] sm:$0xff] }
  0x46   :  { %3034 = vmatpush3.bf16.msra.mxu0 %v3521_v14  ;;  %v4127_v47 = vld [vmem:[%s4800_s0 + $0x78] sm:$0xff]  ;;  %v121_v48 = vpack.c.bf16 %v4117_v45, %v4110_v43  ;;  %v4141_v51 = vld [vmem:[%s4800_s0 + $0x60] sm:$0xff]  ;;  %v4146_v52 = vld [vmem:[%s4800_s0 + $0x50] sm:$0xff] }
  0x47   :  { %3074 = vmatpush3.bf16.msra.mxu1 %v3522_v15  ;;  %3035 = vmatprep.subr.bf16.mxu0 %v3523_v16  ;;  %v123_v49 = vpack.c.bf16 %v4127_v47, %v4122_v46  ;;  %v4151_v53 = vld [vmem:[%s4800_s0 + $0x70] sm:$0xff]  ;;  %v4156_v54 = vld [vmem:[%s4800_s0 + $0x88] sm:$0xff]  ;;  %v4166_v56 = vld [vmem:[%s4800_s0 + $0x98] sm:$0xff]  ;;  %v120_v58 = vpack.c.bf16 %v4141_v51, %v4136_v50 }
  0x48   :  { %3075 = vmatprep.subr.bf16.mxu1 %v3524_v17  ;;  %485 = vmatprep.mubr.bf16.mxu1 %v119_v39  ;;  %v4161_v55 = vld [vmem:[%s4800_s0 + $0xa8] sm:$0xff]  ;;  %v4171_v57 = vld [vmem:[%s4800_s0 + $0xb8] sm:$0xff]  ;;  %v122_v59 = vpack.c.bf16 %v4151_v53, %v4146_v52  ;;  %v4184_v62 = vld [vmem:[%s4800_s0 + $0x80] sm:$0xff] }
  0x49   :  { %v125_v60 = vpack.c.bf16 %v4161_v55, %v4156_v54  ;;  %v127_v61 = vpack.c.bf16 %v4171_v57, %v4166_v56  ;;  %v4189_v63 = vld [vmem:[%s4800_s0 + $0xa0] sm:$0xff]  ;;  %v4194_v0 = vld [vmem:[%s4800_s0 + $0x90] sm:$0xff]  ;;  %v4204_v2 = vld [vmem:[%s4800_s0 + $0xc8] sm:$0xff] }
  0x4a   :  { %3036 = vmatpush3.bf16.msra.mxu0 %v3525_v18  ;;  %v4199_v1 = vld [vmem:[%s4800_s0 + $0xb0] sm:$0xff]  ;;  %v4209_v3 = vld [vmem:[%s4800_s0 + $0xe8] sm:$0xff]  ;;  %v4214_v4 = vld [vmem:[%s4800_s0 + $0xd8] sm:$0xff]  ;;  %v124_v6 = vpack.c.bf16 %v4189_v63, %v4184_v62 }
  0x4b   :  { %3076 = vmatpush3.bf16.msra.mxu1 %v3526_v19  ;;  %3037 = vmatprep.subr.bf16.mxu0 %v3527_v20  ;;  %v4219_v5 = vld [vmem:[%s4800_s0 + $0xf8] sm:$0xff]  ;;  %v126_v7 = vpack.c.bf16 %v4199_v1, %v4194_v0  ;;  %v129_v8 = vpack.c.bf16 %v4209_v3, %v4204_v2  ;;  %v4232_v10 = vld [vmem:[%s4800_s0 + $0xc0] sm:$0xff]  ;;  %v4242_v12 = vld [vmem:[%s4800_s0 + $0xd0] sm:$0xff] }
  0x4c   :  { %3077 = vmatprep.subr.bf16.mxu1 %v3528_v21  ;;  %v131_v9 = vpack.c.bf16 %v4219_v5, %v4214_v4  ;;  %v4237_v11 = vld [vmem:[%s4800_s0 + $0xe0] sm:$0xff]  ;;  %v4247_v13 = vld [vmem:[%s4800_s0 + $0xf0] sm:$0xff]  ;;  %v571_v20 = vld [vmem:[%s4802_s2 + $0x8] sm:$0xff] }
  0x4d   :  { %v128_v14 = vpack.c.bf16 %v4237_v11, %v4232_v10  ;;  %v130_v15 = vpack.c.bf16 %v4247_v13, %v4242_v12  ;;  %v570_v16 = vld [vmem:[%s4802_s2] sm:$0xff]  ;;  %v2931_v21 = vcombine.high %v571_v20, %v571_v20 }
  0x4e   :  { %3038 = vmatpush3.bf16.msra.mxu0 %v3529_v22  ;;  %v2929_v17 = vcombine.high %v570_v16, %v570_v16  ;;  %v2928_v18 = vcombine.low %v570_v16, %v570_v16  ;;  %v2930_v22 = vcombine.low %v571_v20, %v571_v20 }
  0x4f   :  { %3078 = vmatpush3.bf16.msra.mxu1 %v3530_v23  ;;  %3039 = vmatprep.subr.bf16.mxu0 %v3531_v24  ;;  %v3839_v24 = vmov 0  }
  0x50   :  { %3079 = vmatprep.subr.bf16.mxu1 %v3532_v25  ;;  %v597_v19 = vsel %vm595_vm0, %v2928_v18, 0  ;;  %v603_v23 = vsel %vm595_vm0, %v2930_v22, 0  ;;  %v3543_v25 = vld [vmem:[#allocation2 + $0x40] sm:$0xff]  }
  0x52   :  { %3040 = vmatpush3.bf16.msra.mxu0 %v3533_v26  ;;  %v3545_v26 = vld [vmem:[#allocation2 + $0xc0] sm:$0xff]  }
  0x53   :  { %3080 = vmatpush3.bf16.msra.mxu1 %v3534_v27  ;;  %3041 = vmatprep.subr.bf16.mxu0 %v3535_v28 }
  0x54   :  { %3081 = vmatprep.subr.bf16.mxu1 %v3536_v29 }
  0x56   :  { %3042 = vmatpush3.bf16.msra.mxu0 %v3537_v30 }
  0x57   :  { %3082 = vmatpush3.bf16.msra.mxu1 %v3538_v31  ;;  %2932 = vmatprep.subr.msk.bf16.mxu0 %vm595_vm0, %v2929_v17 }
  0x58   :  { %2937 = vmatprep.subr.msk.bf16.mxu1 %vm595_vm0, %v2931_v21 }
  0x59   :  { %421 = vmatmul.mubr.bf16.vlgmr.msra.gmra.mrb[0].mxu0 %v116_v40 }
  0x5a   :  { %486 = vmatmul.mubr.bf16.vlgmr.msra.gmra.mrb[0].mxu1 %v118_v44  ;;  %428 = vmatprep.mubr.bf16.mxu0 %v121_v48 }
  0x5b   :  { %493 = vmatprep.mubr.bf16.mxu1 %v123_v49  ;;  %609 = vmatpush1.bf16.msra.mxu0 %v597_v19 }
  0x5c   :  { %682 = vmatpush1.bf16.msra.mxu1 %v603_v23  ;;  %3107 = vmatprep.subr.bf16.mxu0 %v3543_v25 }
  0x5d   :  { %3147 = vmatprep.subr.bf16.mxu1 %v3545_v26 }
  0x61   :  { %429 = vmatmul.mubr.bf16.gmra.mrb[4].mxu0 %v120_v58 }
  0x62   :  { %494 = vmatmul.mubr.bf16.gmra.mrb[4].mxu1 %v122_v59  ;;  %436 = vmatprep.mubr.bf16.mxu0 %v125_v60 }
  0x63   :  { %501 = vmatprep.mubr.bf16.mxu1 %v127_v61 }
  0x69   :  { %437 = vmatmul.mubr.bf16.gmra.mrb[8].mxu0 %v124_v6 }
  0x6a   :  { %502 = vmatmul.mubr.bf16.gmra.mrb[8].mxu1 %v126_v7  ;;  %444 = vmatprep.mubr.bf16.mxu0 %v129_v8 }
  0x6b   :  { %509 = vmatprep.mubr.bf16.mxu1 %v131_v9 }
  0x71   :  { %445 = vmatmul.mubr.bf16.gmra.mrb[12].mxu0 %v128_v14 }
  0x72   :  { %510 = vmatmul.mubr.bf16.gmra.mrb[12].mxu1 %v130_v15  ;;  %640 = vmatprep.mubr.bf16.mxu0 %v3839_v24 }
  0x73   :  { %713 = vmatprep.mubr.bf16.mxu1 %v3839_v24 }
 0x12c   :  { %v3043_v27 = vpop.f32.mrb[0].mxu0 }
 0x12d   :  { %v3083_v28 = vpop.f32.mrb[0].mxu1  ;;  %v3044_v29 = vpop.f32.mrb[1].mxu0 }
 0x12e   :  { %v3045_v30 = vadd.f32 %v3044_v29, %v3043_v27  ;;  %v3084_v31 = vpop.f32.mrb[1].mxu1  ;;  %v3046_v35 = vpop.f32.mrb[2].mxu0 }
 0x12f   :  { %v3085_v39 = vadd.f32 %v3084_v31, %v3083_v28  ;;  %v3086_v40 = vpop.f32.mrb[2].mxu1  ;;  %v3047_v44 = vpop.f32.mrb[3].mxu0 }
 0x130   :  { %v3048_v48 = vadd.f32 %v3047_v44, %v3046_v35  ;;  %v3087_v49 = vpop.f32.mrb[3].mxu1 }
 0x131   :  { %v488_v58 = vadd.f32 %v3085_v39, %v3045_v30  ;;  %v3088_v59 = vadd.f32 %v3087_v49, %v3086_v40 }
 0x133   :  { %v2920_v60 = vmul.f32 -1.442695, %v488_v58  ;;  %v491_v61 = vadd.f32 %v3088_v59, %v3048_v48 }
 0x134   :  { %v3049_v6 = vpop.f32.mrb[4].mxu0 }
 0x135   :  { %3583 = vpow2.f32 %v2920_v60  ;;  %v2921_v7 = vmul.f32 -1.442695, %v491_v61  ;;  %v3089_v8 = vpop.f32.mrb[4].mxu1  ;;  %v3050_v9 = vpop.f32.mrb[5].mxu0 }
 0x136   :  { %v3051_v14 = vadd.f32 %v3050_v9, %v3049_v6  ;;  %v3090_v15 = vpop.f32.mrb[5].mxu1  ;;  %v3052_v16 = vpop.f32.mrb[6].mxu0 }
 0x137   :  { %3585 = vpow2.f32 %v2921_v7  ;;  %v3091_v17 = vadd.f32 %v3090_v15, %v3089_v8  ;;  %v3092_v18 = vpop.f32.mrb[6].mxu1  ;;  %v3053_v19 = vpop.f32.mrb[7].mxu0 }
 0x138   :  { %v3054_v20 = vadd.f32 %v3053_v19, %v3052_v16  ;;  %v3093_v21 = vpop.f32.mrb[7].mxu1 }
 0x139   :  { %v496_v22 = vadd.f32 %v3091_v17, %v3051_v14  ;;  %v3094_v23 = vadd.f32 %v3093_v21, %v3092_v18 }
 0x13b   :  { %v2922_v25 = vmul.f32 -1.442695, %v496_v22  ;;  %v499_v26 = vadd.f32 %v3094_v23, %v3054_v20 }
 0x13c   :  { %v3055_v27 = vpop.f32.mrb[8].mxu0 }
 0x13d   :  { %3587 = vpow2.f32 %v2922_v25  ;;  %v2923_v28 = vmul.f32 -1.442695, %v499_v26  ;;  %v3095_v29 = vpop.f32.mrb[8].mxu1  ;;  %v3056_v30 = vpop.f32.mrb[9].mxu0 }
 0x13e   :  { %v3057_v31 = vadd.f32 %v3056_v30, %v3055_v27  ;;  %v3096_v35 = vpop.f32.mrb[9].mxu1  ;;  %v3058_v39 = vpop.f32.mrb[10].mxu0 }
 0x13f   :  { %v3584_v40 = vpop.eup %3583  ;;  %3589 = vpow2.f32 %v2923_v28  ;;  %v3097_v44 = vadd.f32 %v3096_v35, %v3095_v29  ;;  %v3098_v48 = vpop.f32.mrb[10].mxu1 }
 0x140   :  { %v3059_v49 = vpop.f32.mrb[11].mxu0  ;;  %v542_v58 = vadd.f32 1.0, %v3584_v40  ;;  %v3099_v60 = vpop.f32.mrb[11].mxu1 }
 0x141   :  { %v3060_v59 = vadd.f32 %v3059_v49, %v3058_v39  ;;  %v3586_v61 = vpop.eup %3585  ;;  %v504_v6 = vadd.f32 %v3097_v44, %v3057_v31  ;;  %v3100_v7 = vadd.f32 %v3099_v60, %v3098_v48 }
 0x142   :  { %v543_v8 = vadd.f32 1.0, %v3586_v61  ;;  %3591 = vrcp.f32 %v542_v58  ;;  %v3544_v61 = vld [vmem:[#allocation2] sm:$0xff]  }
 0x143   :  { %v2924_v9 = vmul.f32 -1.442695, %v504_v6  ;;  %v507_v14 = vadd.f32 %v3100_v7, %v3060_v59  ;;  %v3546_v6 = vld [vmem:[#allocation2 + $0x80] sm:$0xff]  }
 0x144   :  { %3593 = vrcp.f32 %v543_v8  ;;  %v3061_v15 = vpop.f32.mrb[12].mxu0  ;;  %v3547_v8 = vld [vmem:[#allocation2 + $0x48] sm:$0xff]  }
 0x145   :  { %3595 = vpow2.f32 %v2924_v9  ;;  %v2925_v16 = vmul.f32 -1.442695, %v507_v14  ;;  %v3101_v17 = vpop.f32.mrb[12].mxu1  ;;  %v3062_v18 = vpop.f32.mrb[13].mxu0  ;;  %v3549_v9 = vld [vmem:[#allocation2 + $0xc8] sm:$0xff]  }
 0x146   :  { %v3063_v19 = vadd.f32 %v3062_v18, %v3061_v15  ;;  %v3102_v20 = vpop.f32.mrb[13].mxu1  ;;  %v3064_v21 = vpop.f32.mrb[14].mxu0  ;;  %v3551_v18 = vld [vmem:[#allocation2 + $0x50] sm:$0xff]  }
 0x147   :  { %v3588_v22 = vpop.eup %3587  ;;  %3597 = vpow2.f32 %v2925_v16  ;;  %v3103_v23 = vadd.f32 %v3102_v20, %v3101_v17  ;;  %v3104_v25 = vpop.f32.mrb[14].mxu1  ;;  %v3548_v16 = vld [vmem:[#allocation2 + $0x8] sm:$0xff]  }
 0x148   :  { %v3065_v26 = vpop.f32.mrb[15].mxu0  ;;  %v544_v27 = vadd.f32 1.0, %v3588_v22  ;;  %v3105_v29 = vpop.f32.mrb[15].mxu1  ;;  %v3550_v17 = vld [vmem:[#allocation2 + $0x88] sm:$0xff]  }
 0x149   :  { %v3066_v28 = vadd.f32 %v3065_v26, %v3064_v21  ;;  %v3590_v30 = vpop.eup %3589  ;;  %v512_v31 = vadd.f32 %v3103_v23, %v3063_v19  ;;  %v3106_v35 = vadd.f32 %v3105_v29, %v3104_v25  ;;  %v3553_v19 = vld [vmem:[#allocation2 + $0xd0] sm:$0xff]   ;;  %v3557_v29 = vld [vmem:[#allocation2 + $0xd8] sm:$0xff]  }
 0x14a   :  { %v545_v39 = vadd.f32 1.0, %v3590_v30  ;;  %3599 = vrcp.f32 %v544_v27  ;;  %v3552_v25 = vld [vmem:[#allocation2 + $0x10] sm:$0xff]  }
 0x14b   :  { %v2926_v40 = vmul.f32 -1.442695, %v512_v31  ;;  %v515_v44 = vadd.f32 %v3106_v35, %v3066_v28  ;;  %v3554_v26 = vld [vmem:[#allocation2 + $0x90] sm:$0xff]   ;;  %v3555_v28 = vld [vmem:[#allocation2 + $0x58] sm:$0xff]  }
 0x14c   :  { %3601 = vrcp.f32 %v545_v39  ;;  %v3592_v48 = vpop.eup %3591  ;;  %v3556_v35 = vld [vmem:[#allocation2 + $0x18] sm:$0xff]  }
 0x14d   :  { %3603 = vpow2.f32 %v2926_v40  ;;  %v2927_v49 = vmul.f32 -1.442695, %v515_v44  ;;  %v3558_v39 = vld [vmem:[#allocation2 + $0x98] sm:$0xff]   ;;  %v3559_v40 = vld [vmem:[#allocation2 + $0x60] sm:$0xff]  }
 0x14e   :  { %v3594_v58 = vpop.eup %3593  ;;  %v3561_v44 = vld [vmem:[#allocation2 + $0xe0] sm:$0xff]  }
 0x14f   :  { %v3596_v59 = vpop.eup %3595  ;;  %3605 = vpow2.f32 %v2927_v49  ;;  %v566_v60 = vpack.c.bf16 %v3594_v58, %v3592_v48 }
 0x150   :  { %v546_v7 = vadd.f32 1.0, %v3596_v59  ;;  %v3560_v59 = vld [vmem:[#allocation2 + $0x20] sm:$0xff]  }
 0x151   :  { %v3598_v14 = vpop.eup %3597  ;;  %2933 = vmatmul.mubr.msk.bf16.vlgmr.msra.gmra.mrb[16].mxu0 %vm582_vm1, %v566_v60  ;;  %2938 = vmatmul.mubr.msk.bf16.vlgmr.msra.gmra.mrb[16].mxu1 %vm582_vm1, %v566_v60  ;;  %v3562_v60 = vld [vmem:[#allocation2 + $0xa0] sm:$0xff]  }
 0x152   :  { %v547_v15 = vadd.f32 1.0, %v3598_v14  ;;  %650 = vmatprep.mubr.bf16.mxu0 %v3839_v24  ;;  %723 = vmatprep.mubr.bf16.mxu1 %v3839_v24  ;;  %3607 = vrcp.f32 %v546_v7  ;;  %v3564_v7 = vld [vmem:[#allocation2 + $0x28] sm:$0xff]  }
 0x153   :  { %3108 = vmatpush3.bf16.msra.mxu0 %v3544_v61  ;;  %3148 = vmatpush3.bf16.msra.mxu1 %v3546_v6  ;;  %v3563_v61 = vld [vmem:[#allocation2 + $0x68] sm:$0xff]  }
 0x154   :  { %3609 = vrcp.f32 %v547_v15  ;;  %3109 = vmatprep.subr.bf16.mxu0 %v3547_v8  ;;  %3149 = vmatprep.subr.bf16.mxu1 %v3549_v9  ;;  %v3600_v20 = vpop.eup %3599  ;;  %v3565_v6 = vld [vmem:[#allocation2 + $0xe8] sm:$0xff]  }
 0x155   :  { %v3566_v8 = vld [vmem:[#allocation2 + $0xa8] sm:$0xff]  }
 0x156   :  { %v3602_v21 = vpop.eup %3601 }
 0x157   :  { %v3604_v22 = vpop.eup %3603  ;;  %v567_v23 = vpack.c.bf16 %v3602_v21, %v3600_v20  ;;  %3110 = vmatpush3.bf16.msra.mxu0 %v3548_v16  ;;  %3150 = vmatpush3.bf16.msra.mxu1 %v3550_v17  ;;  %v3567_v16 = vld [vmem:[#allocation2 + $0x70] sm:$0xff]   ;;  %v3571_v20 = vld [vmem:[#allocation2 + $0x78] sm:$0xff]  }
 0x158   :  { %v548_v27 = vadd.f32 1.0, %v3604_v22  ;;  %3111 = vmatprep.subr.bf16.mxu0 %v3551_v18  ;;  %3151 = vmatprep.subr.bf16.mxu1 %v3553_v19  ;;  %v3569_v17 = vld [vmem:[#allocation2 + $0xf0] sm:$0xff]   ;;  %v3573_v21 = vld [vmem:[#allocation2 + $0xf8] sm:$0xff]  }
 0x159   :  { %v3606_v30 = vpop.eup %3605  ;;  %2934 = vmatmul.mubr.msk.bf16.gmra.mrb[20].mxu0 %vm582_vm1, %v567_v23  ;;  %2939 = vmatmul.mubr.msk.bf16.gmra.mrb[20].mxu1 %vm582_vm1, %v567_v23  ;;  %v3568_v18 = vld [vmem:[#allocation2 + $0x30] sm:$0xff]   ;;  %v3572_v22 = vld [vmem:[#allocation2 + $0x38] sm:$0xff]  }
 0x15a   :  { %v549_v31 = vadd.f32 1.0, %v3606_v30  ;;  %660 = vmatprep.mubr.bf16.mxu0 %v3839_v24  ;;  %733 = vmatprep.mubr.bf16.mxu1 %v3839_v24  ;;  %3611 = vrcp.f32 %v548_v27  ;;  %v3570_v19 = vld [vmem:[#allocation2 + $0xb0] sm:$0xff]   ;;  %v3574_v23 = vld [vmem:[#allocation2 + $0xb8] sm:$0xff]  }
 0x15b   :  { %3112 = vmatpush3.bf16.msra.mxu0 %v3552_v25  ;;  %3152 = vmatpush3.bf16.msra.mxu1 %v3554_v26  ;;  %v3840_v25 = vmov 0.0  }
 0x15c   :  { %3613 = vrcp.f32 %v549_v31  ;;  %3113 = vmatprep.subr.bf16.mxu0 %v3555_v28  ;;  %3153 = vmatprep.subr.bf16.mxu1 %v3557_v29  ;;  %v3608_v48 = vpop.eup %3607 }
 0x15e   :  { %v3610_v49 = vpop.eup %3609 }
 0x15f   :  { %v568_v58 = vpack.c.bf16 %v3610_v49, %v3608_v48  ;;  %3114 = vmatpush3.bf16.msra.mxu0 %v3556_v35  ;;  %3154 = vmatpush3.bf16.msra.mxu1 %v3558_v39 }
 0x160   :  { %3115 = vmatprep.subr.bf16.mxu0 %v3559_v40  ;;  %3155 = vmatprep.subr.bf16.mxu1 %v3561_v44 }
 0x161   :  { %2935 = vmatmul.mubr.msk.bf16.gmra.mrb[24].mxu0 %vm582_vm1, %v568_v58  ;;  %2940 = vmatmul.mubr.msk.bf16.gmra.mrb[24].mxu1 %vm582_vm1, %v568_v58 }
 0x162   :  { %670 = vmatprep.mubr.bf16.mxu0 %v3839_v24  ;;  %743 = vmatprep.mubr.bf16.mxu1 %v3839_v24 }
 0x163   :  { %3116 = vmatpush3.bf16.msra.mxu0 %v3560_v59  ;;  %3156 = vmatpush3.bf16.msra.mxu1 %v3562_v60 }
 0x164   :  { %3117 = vmatprep.subr.bf16.mxu0 %v3563_v61  ;;  %3157 = vmatprep.subr.bf16.mxu1 %v3565_v6  ;;  %v3612_v9 = vpop.eup %3611 }
 0x166   :  { %v3614_v14 = vpop.eup %3613 }
 0x167   :  { %v569_v15 = vpack.c.bf16 %v3614_v14, %v3612_v9  ;;  %3118 = vmatpush3.bf16.msra.mxu0 %v3564_v7  ;;  %3158 = vmatpush3.bf16.msra.mxu1 %v3566_v8  ;;  %v4285_v9 = vld [vmem:[#allocation5] sm:$0xff]  }
 0x168   :  { %3119 = vmatprep.subr.bf16.mxu0 %v3567_v16  ;;  %3159 = vmatprep.subr.bf16.mxu1 %v3569_v17 }
 0x169   :  { %2936 = vmatmul.mubr.msk.bf16.gmra.mrb[28].mxu0 %vm582_vm1, %v569_v15  ;;  %2941 = vmatmul.mubr.msk.bf16.gmra.mrb[28].mxu1 %vm582_vm1, %v569_v15 }
 0x16b   :  { %3120 = vmatpush3.bf16.msra.mxu0 %v3568_v18  ;;  %3160 = vmatpush3.bf16.msra.mxu1 %v3570_v19 }
 0x16c   :  { %3121 = vmatprep.subr.bf16.mxu0 %v3571_v20  ;;  %3161 = vmatprep.subr.bf16.mxu1 %v3573_v21 }
 0x16f   :  { %3122 = vmatpush3.bf16.msra.mxu0 %v3572_v22  ;;  %3162 = vmatpush3.bf16.msra.mxu1 %v3574_v23 }
 0x170   :  { %3262 = vmatprep.subr.bf16.mxu0 %v3840_v25  ;;  %3270 = vmatprep.subr.bf16.mxu1 %v3840_v25 }
 0x224   :  { %v642_v26 = vpop.f32.mrb[16].mxu0  ;;  %v715_v27 = vpop.f32.mrb[16].mxu1 }
 0x225   :  { %v644_v28 = vpop.f32.mrb[17].mxu0  ;;  %v717_v29 = vpop.f32.mrb[17].mxu1  ;;  %v754_v35 = vmul.f32 %v642_v26, %v4086_v37  ;;  %v756_v39 = vmul.f32 %v715_v27, %v4100_v41 }
 0x226   :  { %v646_v30 = vpop.f32.mrb[18].mxu0  ;;  %v719_v31 = vpop.f32.mrb[18].mxu1  ;;  %v755_v58 = vmul.f32 %v644_v28, %v4064_v32  ;;  %v757_v59 = vmul.f32 %v717_v29, %v4074_v34  ;;  %v4288_v34 = vld [vmem:[#allocation5 + $0x8] sm:$0xff]  }
 0x227   :  { %v758_v40 = vmul.f32 %v646_v30, %v4091_v38  ;;  %v760_v44 = vmul.f32 %v719_v31, %v4105_v42  ;;  %v648_v48 = vpop.f32.mrb[19].mxu0  ;;  %v721_v49 = vpop.f32.mrb[19].mxu1 }
 0x228   :  { %v759_v60 = vmul.f32 %v648_v48, %v4069_v33  ;;  %v761_v61 = vmul.f32 %v721_v49, %v4081_v36 }
 0x229   :  { %v786_v6 = vpack.c.bf16 %v758_v40, %v754_v35  ;;  %v788_v7 = vpack.c.bf16 %v760_v44, %v756_v39 }
 0x22a   :  { %v787_v8 = vpack.c.bf16 %v759_v60, %v755_v58  ;;  %v789_v37 = vpack.c.bf16 %v761_v61, %v757_v59 }
 0x22c   :  { %v652_v41 = vpop.f32.mrb[20].mxu0  ;;  %v725_v38 = vpop.f32.mrb[20].mxu1  ;;  %1097 = vmatprep.mubr.bf16.mxu0 %v787_v8  ;;  %1162 = vmatprep.mubr.bf16.mxu1 %v789_v37 }
 0x22d   :  { %v654_v42 = vpop.f32.mrb[21].mxu0  ;;  %v727_v14 = vpop.f32.mrb[21].mxu1  ;;  %1098 = vmatmul.mubr.bf16.vlgmr.msra.gmra.mrb[32].mxu0 %v786_v6  ;;  %1163 = vmatmul.mubr.bf16.vlgmr.msra.gmra.mrb[32].mxu1 %v788_v7  ;;  %v762_v36 = vmul.f32 %v652_v41, %v4136_v50  ;;  %v764_v15 = vmul.f32 %v725_v38, %v4146_v52 }
 0x22e   :  { %3263 = vmatpush3.bf16.msra.mxu0 %v4285_v9  ;;  %v656_v32 = vpop.f32.mrb[22].mxu0  ;;  %v729_v33 = vpop.f32.mrb[22].mxu1  ;;  %v763_v20 = vmul.f32 %v654_v42, %v4110_v43  ;;  %v765_v21 = vmul.f32 %v727_v14, %v4122_v46 }
 0x22f   :  { %v766_v16 = vmul.f32 %v656_v32, %v4141_v51  ;;  %v768_v17 = vmul.f32 %v729_v33, %v4151_v53  ;;  %v658_v18 = vpop.f32.mrb[23].mxu0  ;;  %v731_v19 = vpop.f32.mrb[23].mxu1  ;;  %3264 = vmatprep.subr.bf16.mxu0 %v3840_v25 }
 0x230   :  { %v767_v22 = vmul.f32 %v658_v18, %v4117_v45  ;;  %v769_v23 = vmul.f32 %v731_v19, %v4127_v47 }
 0x231   :  { %v790_v26 = vpack.c.bf16 %v766_v16, %v762_v36  ;;  %v792_v50 = vpack.c.bf16 %v768_v17, %v764_v15 }
 0x232   :  { %v791_v27 = vpack.c.bf16 %v767_v22, %v763_v20  ;;  %v793_v52 = vpack.c.bf16 %v769_v23, %v765_v21  ;;  %3265 = vmatpush3.bf16.msra.mxu0 %v4288_v34 }
 0x233   :  { %3278 = vmatprep.subr.bf16.mxu0 %v3840_v25 }
 0x234   :  { %v662_v51 = vpop.f32.mrb[24].mxu0  ;;  %v735_v53 = vpop.f32.mrb[24].mxu1  ;;  %1105 = vmatprep.mubr.bf16.mxu0 %v791_v27  ;;  %1170 = vmatprep.mubr.bf16.mxu1 %v793_v52 }
 0x235   :  { %v664_v28 = vpop.f32.mrb[25].mxu0  ;;  %v737_v43 = vpop.f32.mrb[25].mxu1  ;;  %1106 = vmatmul.mubr.bf16.gmra.mrb[36].mxu0 %v790_v26  ;;  %1171 = vmatmul.mubr.bf16.gmra.mrb[36].mxu1 %v792_v50  ;;  %v770_v47 = vmul.f32 %v662_v51, %v4184_v62  ;;  %v772_v29 = vmul.f32 %v735_v53, %v4194_v0 }
 0x236   :  { %v666_v46 = vpop.f32.mrb[26].mxu0  ;;  %v739_v45 = vpop.f32.mrb[26].mxu1  ;;  %v771_v40 = vmul.f32 %v664_v28, %v4156_v54  ;;  %v773_v44 = vmul.f32 %v737_v43, %v4166_v56 }
 0x237   :  { %v774_v30 = vmul.f32 %v666_v46, %v4189_v63  ;;  %v776_v31 = vmul.f32 %v739_v45, %v4199_v1  ;;  %v668_v35 = vpop.f32.mrb[27].mxu0  ;;  %v741_v39 = vpop.f32.mrb[27].mxu1 }
 0x238   :  { %v775_v48 = vmul.f32 %v668_v35, %v4161_v55  ;;  %v777_v49 = vmul.f32 %v741_v39, %v4171_v57 }
 0x239   :  { %v794_v58 = vpack.c.bf16 %v774_v30, %v770_v47  ;;  %v796_v59 = vpack.c.bf16 %v776_v31, %v772_v29 }
 0x23a   :  { %v795_v60 = vpack.c.bf16 %v775_v48, %v771_v40  ;;  %v797_v62 = vpack.c.bf16 %v777_v49, %v773_v44 }
 0x23c   :  { %v672_v61 = vpop.f32.mrb[28].mxu0  ;;  %v745_v0 = vpop.f32.mrb[28].mxu1  ;;  %1113 = vmatprep.mubr.bf16.mxu0 %v795_v60  ;;  %1178 = vmatprep.mubr.bf16.mxu1 %v797_v62 }
 0x23d   :  { %v674_v63 = vpop.f32.mrb[29].mxu0  ;;  %v747_v1 = vpop.f32.mrb[29].mxu1  ;;  %1114 = vmatmul.mubr.bf16.gmra.mrb[40].mxu0 %v794_v58  ;;  %1179 = vmatmul.mubr.bf16.gmra.mrb[40].mxu1 %v796_v59  ;;  %v778_v56 = vmul.f32 %v672_v61, %v4232_v10  ;;  %v780_v55 = vmul.f32 %v745_v0, %v4242_v12  ;;  %v1195_v61 = vlaneseq }
 0x23e   :  { %v676_v6 = vpop.f32.mrb[30].mxu0  ;;  %v749_v54 = vpop.f32.mrb[30].mxu1  ;;  %v779_v41 = vmul.f32 %v674_v63, %v4204_v2  ;;  %v781_v38 = vmul.f32 %v747_v1, %v4214_v4  ;;  %v4327_v4 = vld [vmem:[%s4805_s5] ss:$0 sm:$0xff]  ;;  %s3843_s5 = smov 32  }
 0x23f   :  { %v782_v57 = vmul.f32 %v676_v6, %v4237_v11  ;;  %v784_v7 = vmul.f32 %v749_v54, %v4247_v13  ;;  %v678_v8 = vpop.f32.mrb[31].mxu0  ;;  %v751_v37 = vpop.f32.mrb[31].mxu1 }
 0x240   :  { %v783_v42 = vmul.f32 %v678_v8, %v4209_v3  ;;  %v785_v14 = vmul.f32 %v751_v37, %v4219_v5 }
 0x241   :  { %v798_v32 = vpack.c.bf16 %v782_v57, %v778_v56  ;;  %v800_v33 = vpack.c.bf16 %v784_v7, %v780_v55  ;;  %v1196_v55 = vand.u32 127, %v1195_v61 }
 0x242   :  { %v799_v36 = vpack.c.bf16 %v783_v42, %v779_v41  ;;  %v801_v10 = vpack.c.bf16 %v785_v14, %v781_v38 }
 0x243   :  { %vm1197_vm3 = vcmp.ge.s32.totalorder %v1196_v55, 64  ;;  %vm1198_vm4 = vcmp.lt.s32.totalorder %v1196_v55, 96 }
 0x244   :  { %1121 = vmatprep.mubr.bf16.mxu0 %v799_v36  ;;  %1186 = vmatprep.mubr.bf16.mxu1 %v801_v10  ;;  %vm4346_vm5 = vmand %vm1197_vm3, %vm1198_vm4 }
 0x245   :  { %1122 = vmatmul.mubr.bf16.gmra.mrb[44].mxu0 %v798_v32  ;;  %1187 = vmatmul.mubr.bf16.gmra.mrb[44].mxu1 %v800_v33 }
 0x246   :  { %3266 = vmatprep.mubr.msk.bf16.mxu0 %vm3841_vm2, %v3840_v25  ;;  %3274 = vmatprep.mubr.msk.bf16.mxu1 %vm3841_vm2, %v3840_v25 }
 0x24d   :  { %3267 = vmatmul.mubr.bf16.vlgmr.msra.gmra.mrb[48].mxu0 %v3839_v24 }
 0x24e   :  { %3282 = vmatprep.mubr.msk.bf16.mxu0 %vm3841_vm2, %v3840_v25 }
 0x300   :  { %v3123_v2 = vpop.f32.mrb[32].mxu0  ;;  %v3163_v3 = vpop.f32.mrb[32].mxu1 }
 0x301   :  { %v3124_v5 = vpop.f32.mrb[33].mxu0  ;;  %v3164_v11 = vpop.f32.mrb[33].mxu1 }
 0x302   :  { %v3125_v12 = vadd.f32 %v3124_v5, %v3123_v2  ;;  %v3165_v13 = vadd.f32 %v3164_v11, %v3163_v3  ;;  %v3126_v15 = vpop.f32.mrb[34].mxu0  ;;  %v3166_v16 = vpop.f32.mrb[34].mxu1 }
 0x303   :  { %v3127_v17 = vpop.f32.mrb[35].mxu0  ;;  %v3167_v18 = vpop.f32.mrb[35].mxu1 }
 0x304   :  { %v1100_v24 = vadd.f32 %v3125_v12, %v4327_v4  ;;  %v3128_v19 = vadd.f32 %v3127_v17, %v3126_v15  ;;  %v3168_v20 = vadd.f32 %v3167_v18, %v3166_v16  ;;  %v3842_v15 = vmov 1.0  }
 0x305   :  { %v4355_v16 = vsel %vm4346_vm5, 2.0, %v3842_v15 }
 0x306   :  { %v1103_v21 = vadd.f32 %v3128_v19, %v4327_v4  ;;  %v1165_v22 = vadd.f32 %v3165_v13, %v1100_v24 }
 0x308   :  { %v3129_v23 = vpop.f32.mrb[36].mxu0  ;;  %v3169_v26 = vpop.f32.mrb[36].mxu1  ;;  %v4331_v50 = vadd.f32 %v3168_v20, %v1103_v21 }
 0x309   :  { %v3130_v27 = vpop.f32.mrb[37].mxu0  ;;  %v3170_v52 = vpop.f32.mrb[37].mxu1 }
 0x30a   :  { %v3131_v51 = vadd.f32 %v3130_v27, %v3129_v23  ;;  %v3171_v53 = vadd.f32 %v3170_v52, %v3169_v26  ;;  %v3132_v28 = vpop.f32.mrb[38].mxu0  ;;  %v3172_v43 = vpop.f32.mrb[38].mxu1 }
 0x30b   :  { %v3133_v46 = vpop.f32.mrb[39].mxu0  ;;  %v3173_v45 = vpop.f32.mrb[39].mxu1 }
 0x30c   :  { %v1108_v47 = vadd.f32 %v3131_v51, %v4327_v4  ;;  %v3134_v29 = vadd.f32 %v3133_v46, %v3132_v28  ;;  %v3174_v30 = vadd.f32 %v3173_v45, %v3172_v43  ;;  %v4363_v51 = vsel %vm4346_vm5, -1.0, %v3840_v25 }
 0x30e   :  { %v1111_v31 = vadd.f32 %v3134_v29, %v4327_v4  ;;  %v4335_v35 = vadd.f32 %v3171_v53, %v1108_v47  ;;  %v4375_v29 = vld [vmem:[%s4806_s6] sm:$0xff]  }
 0x30f   :  { %3271 = vmatpush3.bf16.msra.mxu1 %v4375_v29 }
 0x310   :  { %v3135_v39 = vpop.f32.mrb[40].mxu0  ;;  %v3175_v40 = vpop.f32.mrb[40].mxu1  ;;  %v4337_v44 = vadd.f32 %v3174_v30, %v1111_v31  ;;  %v4381_v30 = vld [vmem:[%s4806_s6 + $0x8] sm:$0xff]   ;;  %3272 = vmatprep.subr.bf16.mxu1 %v3840_v25 }
 0x311   :  { %v3136_v48 = vpop.f32.mrb[41].mxu0  ;;  %v3176_v49 = vpop.f32.mrb[41].mxu1 }
 0x312   :  { %v3137_v58 = vadd.f32 %v3136_v48, %v3135_v39  ;;  %v3177_v59 = vadd.f32 %v3176_v49, %v3175_v40  ;;  %v3138_v60 = vpop.f32.mrb[42].mxu0  ;;  %v3178_v62 = vpop.f32.mrb[42].mxu1 }
 0x313   :  { %v3139_v0 = vpop.f32.mrb[43].mxu0  ;;  %v3179_v63 = vpop.f32.mrb[43].mxu1  ;;  %3273 = vmatpush3.bf16.msra.mxu1 %v4381_v30 }
 0x314   :  { %v1116_v1 = vadd.f32 %v3137_v58, %v4327_v4  ;;  %v3140_v6 = vadd.f32 %v3139_v0, %v3138_v60  ;;  %v3180_v54 = vadd.f32 %v3179_v63, %v3178_v62  ;;  %3286 = vmatprep.subr.bf16.mxu1 %v3840_v25  ;;  %v4401_v58 = vld [vmem:[%s4808_s8] ss:$0 sm:$0xff] }
 0x316   :  { %v1119_v56 = vadd.f32 %v3140_v6, %v4327_v4  ;;  %v4341_v57 = vadd.f32 %v3177_v59, %v1116_v1 }
 0x318   :  { %v3141_v7 = vpop.f32.mrb[44].mxu0  ;;  %v3181_v8 = vpop.f32.mrb[44].mxu1  ;;  %v4343_v37 = vadd.f32 %v3180_v54, %v1119_v56 }
 0x319   :  { %v3142_v41 = vpop.f32.mrb[45].mxu0  ;;  %v3182_v38 = vpop.f32.mrb[45].mxu1 }
 0x31a   :  { %v3143_v42 = vadd.f32 %v3142_v41, %v3141_v7  ;;  %v3183_v14 = vadd.f32 %v3182_v38, %v3181_v8  ;;  %v3144_v32 = vpop.f32.mrb[46].mxu0  ;;  %v3184_v33 = vpop.f32.mrb[46].mxu1 }
 0x31b   :  { %v3145_v36 = vpop.f32.mrb[47].mxu0  ;;  %v3185_v10 = vpop.f32.mrb[47].mxu1 }
 0x31c   :  { %v1124_v2 = vadd.f32 %v3143_v42, %v4327_v4  ;;  %v3146_v3 = vadd.f32 %v3145_v36, %v3144_v32  ;;  %v3186_v5 = vadd.f32 %v3185_v10, %v3184_v33 }
 0x31e   :  { %v1127_v12 = vadd.f32 %v3146_v3, %v4327_v4  ;;  %v4351_v13 = vadd.f32 %v3183_v14, %v1124_v2 }
 0x320   :  { %v1271_v17 = vpop.f32.mrb[48].mxu0  ;;  %v4357_v18 = vadd.f32 %v3186_v5, %v1127_v12 }
 0x321   :  { %v1277_v24 = vadd.f32 %v1271_v17, %v1165_v22  ;;  %v3268_v19 = vpop.f32.mrb[49].mxu0 }
 0x322   :  { %v1274_v20 = vpop.f32.mrb[50].mxu0 }
 0x323   :  { %v1278_v21 = vmul.f32 %v1277_v24, %v4355_v16  ;;  %v3269_v23 = vpop.f32.mrb[51].mxu0 }
 0x325   :  { %v2978_v26 = vmul.f32 -1.442695, %v1278_v21 }
 0x327   :  { %3615 = vpow2.f32 %v2978_v26 }
 0x331   :  { %v3616_v27 = vpop.eup %3615 }
 0x332   :  { %v1282_v4 = vadd.f32 1.0, %v3616_v27  ;;  %v4422_v27 = vld [vmem:[#allocation7] sm:$0xff]  }
 0x333   :  { %3279 = vmatpush3.bf16.msra.mxu0 %v4422_v27 }
 0x334   :  { %3617 = vrcp.f32 %v1282_v4  ;;  %v4426_v4 = vld [vmem:[#allocation7 + $0x8] sm:$0xff]   ;;  %3280 = vmatprep.subr.bf16.mxu0 %v3840_v25 }
 0x337   :  { %3281 = vmatpush3.bf16.msra.mxu0 %v4426_v4 }
 0x338   :  { %3294 = vmatprep.subr.bf16.mxu0 %v3840_v25 }
 0x33e   :  { %v3618_v52 = vpop.eup %3617 }
 0x33f   :  { %v1285_v53 = vmul.f32 %v3618_v52, %v4355_v16 }
 0x341   :  { %v1286_v22 = vadd.f32 %v1285_v53, %v4363_v51 }
 0x343   :  { %1289 = vrot.lane.b32.xlu0 %v1286_v22, %s3836_s15  ;;  %v1287_v46 = vmul.f32 0.0, %v1286_v22 }
 0x3b5   :  { %v1290_v28 = vpop.permute.xlu0 %1289 }
 0x3b6   :  { %v1292_v43 = vmul.f32 %v1290_v28, %v1286_v22 }
 0x3b8   :  { %1294 = vrot.lane.b32.xlu0 %v1292_v43, %s3843_s5 }
 0x42a   :  { %v1295_v45 = vpop.permute.xlu0 %1294 }
 0x42b   :  { %v4369_v47 = vadd.f32 %v1295_v45, %v1287_v46 }
 0x42d   :  { %3619 = vtanh.f32 %v4369_v47 }
 0x437   :  { %v3620_v31 = vpop.eup %3619 }
 0x438   :  { %1300 = vrot.lane.b32.xlu1 %v3620_v31, %s3836_s15 }
 0x4aa   :  { %v1301_v39 = vpop.permute.xlu1 %1300 }
 0x4ab   :  { %v1303_v40 = vmul.f32 %v1301_v39, %v1286_v22 }
 0x4ad   :  { %v1304_v48 = vpack.c.bf16 %v1303_v40, %v1303_v40 }
 0x4af   :  { %1306 = vrot.lane.b32.xlu1 %v1304_v48, %s3843_s5 }
 0x521   :  { %v1307_v49 = vpop.permute.xlu1 %1306 }
 0x522   :  { %3275 = vmatmul.mubr.msk.bf16.vlgmr.msra.gmra.mrb[48].mxu1 %vm1233_vm6, %v1307_v49 }
 0x523   :  { %3287 = vmatpush3.bf16.msra.mxu1 %v4285_v9  ;;  %3290 = vmatprep.mubr.msk.bf16.mxu1 %vm3841_vm2, %v3840_v25 }
 0x524   :  { %3288 = vmatprep.subr.bf16.mxu1 %v3840_v25 }
 0x527   :  { %3289 = vmatpush3.bf16.msra.mxu1 %v4288_v34 }
 0x528   :  { %3302 = vmatprep.subr.bf16.mxu1 %v3840_v25 }
 0x52a   :  { %3291 = vmatmul.mubr.msk.bf16.vlgmr.msra.gmra.mrb[52].mxu1 %vm1233_vm6, %v1307_v49 }
 0x52b   :  { %3306 = vmatprep.mubr.msk.bf16.mxu1 %vm3841_vm2, %v3840_v25  ;;  %3303 = vmatpush3.bf16.msra.mxu1 %v4422_v27 }
 0x52c   :  { %3304 = vmatprep.subr.bf16.mxu1 %v3840_v25 }
 0x52f   :  { %3305 = vmatpush3.bf16.msra.mxu1 %v4426_v4 }
 0x530   :  { %3318 = vmatprep.subr.bf16.mxu1 %v3840_v25 }
 0x5f5   :  { %v1357_v59 = vpop.f32.mrb[48].mxu1 }
 0x5f6   :  { %v1358_v60 = vadd.f32 %v4401_v58, %v1357_v59  ;;  %v3276_v62 = vpop.f32.mrb[49].mxu1 }
 0x5f7   :  { %v1360_v61 = vpop.f32.mrb[50].mxu1 }
 0x5f8   :  { %v1363_v0 = vmul.f32 %v1358_v60, %v4355_v16  ;;  %v3277_v63 = vpop.f32.mrb[51].mxu1 }
 0x5fa   :  { %v2982_v1 = vmul.f32 -1.442695, %v1363_v0 }
 0x5fc   :  { %3621 = vpow2.f32 %v2982_v1 }
 0x5fd   :  { %v1482_v6 = vpop.f32.mrb[52].mxu1 }
 0x5fe   :  { %v1488_v54 = vadd.f32 %v1482_v6, %v4331_v50  ;;  %v3292_v56 = vpop.f32.mrb[53].mxu1 }
 0x5ff   :  { %v1485_v55 = vpop.f32.mrb[54].mxu1 }
 0x600   :  { %v1489_v7 = vmul.f32 %v1488_v54, %v4355_v16  ;;  %v3293_v8 = vpop.f32.mrb[55].mxu1 }
 0x602   :  { %v2987_v41 = vmul.f32 -1.442695, %v1489_v7 }
 0x604   :  { %3623 = vpow2.f32 %v2987_v41 }
 0x606   :  { %v3622_v38 = vpop.eup %3621 }
 0x607   :  { %v1367_v42 = vadd.f32 1.0, %v3622_v38 }
 0x609   :  { %3625 = vrcp.f32 %v1367_v42 }
 0x60e   :  { %v3624_v14 = vpop.eup %3623 }
 0x60f   :  { %v1493_v32 = vadd.f32 1.0, %v3624_v14 }
 0x611   :  { %3627 = vrcp.f32 %v1493_v32 }
 0x613   :  { %v3626_v33 = vpop.eup %3625 }
 0x614   :  { %v1370_v36 = vmul.f32 %v3626_v33, %v4355_v16 }
 0x616   :  { %v1371_v10 = vadd.f32 %v1370_v36, %v4363_v51 }
 0x618   :  { %1374 = vrot.lane.b32.xlu0 %v1371_v10, %s3836_s15  ;;  %v1372_v17 = vmul.f32 0.0, %v1371_v10 }
 0x61b   :  { %v3628_v50 = vpop.eup %3627 }
 0x61c   :  { %v1496_v2 = vmul.f32 %v3628_v50, %v4355_v16 }
 0x61e   :  { %v1497_v3 = vadd.f32 %v1496_v2, %v4363_v51 }
 0x620   :  { %1500 = vrot.lane.b32.xlu1 %v1497_v3, %s3836_s15  ;;  %v1498_v20 = vmul.f32 %v1497_v3, %v4369_v47 }
 0x68a   :  { %v1375_v5 = vpop.permute.xlu0 %1374 }
 0x68b   :  { %v1377_v11 = vmul.f32 %v1375_v5, %v1371_v10 }
 0x68d   :  { %1379 = vrot.lane.b32.xlu0 %v1377_v11, %s3843_s5 }
 0x692   :  { %v1501_v12 = vpop.permute.xlu1 %1500 }
 0x693   :  { %v1503_v15 = vmul.f32 %v1501_v12, %v1497_v3 }
 0x695   :  { %1505 = vrot.lane.b32.xlu1 %v1503_v15, %s3843_s5 }
 0x6ff   :  { %v1380_v24 = vpop.permute.xlu0 %1379 }
 0x700   :  { %v4415_v19 = vadd.f32 %v1380_v24, %v1372_v17 }
 0x702   :  { %3629 = vtanh.f32 %v4415_v19 }
 0x707   :  { %v1506_v21 = vpop.permute.xlu1 %1505 }
 0x708   :  { %v4419_v23 = vadd.f32 %v1506_v21, %v1498_v20 }
 0x70a   :  { %3631 = vtanh.f32 %v4419_v23 }
 0x70c   :  { %v3630_v26 = vpop.eup %3629 }
 0x70d   :  { %1385 = vrot.lane.b32.xlu0 %v3630_v26, %s3836_s15 }
 0x714   :  { %v3632_v52 = vpop.eup %3631 }
 0x715   :  { %1511 = vrot.lane.b32.xlu1 %v3632_v52, %s3836_s15 }
 0x77f   :  { %v1386_v53 = vpop.permute.xlu0 %1385 }
 0x780   :  { %v4436_v22 = vmul.f32 %v1386_v53, %v1371_v10 }
 0x782   :  { %v1389_v28 = vpack.c.bf16 %v4436_v22, %v4436_v22 }
 0x784   :  { %1391 = vrot.lane.b32.xlu0 %v1389_v28, %s3843_s5 }
 0x787   :  { %v1512_v43 = vpop.permute.xlu1 %1511 }
 0x788   :  { %v1514_v46 = vmul.f32 %v1512_v43, %v1497_v3 }
 0x78a   :  { %v1515_v45 = vpack.c.bf16 %v1514_v46, %v1514_v46 }
 0x78c   :  { %1517 = vrot.lane.b32.xlu1 %v1515_v45, %s3843_s5 }
 0x7f6   :  { %v1392_v47 = vpop.permute.xlu0 %1391 }
 0x7f7   :  { %3283 = vmatmul.mubr.msk.bf16.vlgmr.msra.gmra.mrb[52].mxu0 %vm1233_vm6, %v1392_v47 }
 0x7f8   :  { %3295 = vmatpush3.bf16.msra.mxu0 %v4375_v29  ;;  %3298 = vmatprep.mubr.msk.bf16.mxu0 %vm3841_vm2, %v3840_v25 }
 0x7f9   :  { %3296 = vmatprep.subr.bf16.mxu0 %v3840_v25 }
 0x7fc   :  { %3297 = vmatpush3.bf16.msra.mxu0 %v4381_v30 }
 0x7fd   :  { %3310 = vmatprep.subr.bf16.mxu0 %v3840_v25 }
 0x7fe   :  { %v1518_v31 = vpop.permute.xlu1 %1517 }
 0x803   :  { %3299 = vmatmul.mubr.msk.bf16.vlgmr.msra.gmra.mrb[52].mxu0 %vm1233_vm6, %v1518_v31 }
 0x804   :  { %3311 = vmatpush3.bf16.msra.mxu0 %v4285_v9  ;;  %3314 = vmatprep.mubr.msk.bf16.mxu0 %vm3841_vm2, %v3840_v25 }
 0x805   :  { %3312 = vmatprep.subr.bf16.mxu0 %v3840_v25 }
 0x808   :  { %3313 = vmatpush3.bf16.msra.mxu0 %v4288_v34 }
 0x809   :  { %3326 = vmatprep.subr.bf16.mxu0 %v3840_v25 }
 0x80b   :  { %3315 = vmatmul.mubr.msk.bf16.vlgmr.msra.gmra.mrb[56].mxu0 %vm1233_vm6, %v1518_v31 }
 0x80c   :  { %3327 = vmatpush3.bf16.msra.mxu0 %v4422_v27  ;;  %3330 = vmatprep.mubr.msk.bf16.mxu0 %vm3841_vm2, %v3840_v25 }
 0x80d   :  { %3328 = vmatprep.subr.bf16.mxu0 %v3840_v25 }
 0x810   :  { %3329 = vmatpush3.bf16.msra.mxu0 %v4426_v4 }
 0x811   :  { %3342 = vmatprep.subr.bf16.mxu0 %v3840_v25 }
 0x8d6   :  { %v1556_v39 = vpop.f32.mrb[52].mxu0 }
 0x8d7   :  { %v3458_v40 = vadd.f32 %v4401_v58, %v1556_v39  ;;  %v3300_v48 = vpop.f32.mrb[53].mxu0 }
 0x8d8   :  { %v1559_v49 = vpop.f32.mrb[54].mxu0 }
 0x8d9   :  { %v1562_v59 = vmul.f32 %v3458_v40, %v4355_v16  ;;  %v3301_v60 = vpop.f32.mrb[55].mxu0 }
 0x8db   :  { %v2989_v62 = vmul.f32 -1.442695, %v1562_v59 }
 0x8dd   :  { %3633 = vpow2.f32 %v2989_v62 }
 0x8de   :  { %v1669_v61 = vpop.f32.mrb[56].mxu0 }
 0x8df   :  { %v1675_v0 = vadd.f32 %v1669_v61, %v4335_v35  ;;  %v3316_v63 = vpop.f32.mrb[57].mxu0 }
 0x8e0   :  { %v1672_v1 = vpop.f32.mrb[58].mxu0 }
 0x8e1   :  { %v1676_v6 = vmul.f32 %v1675_v0, %v4355_v16  ;;  %v3317_v54 = vpop.f32.mrb[59].mxu0 }
 0x8e3   :  { %v2992_v56 = vmul.f32 -1.442695, %v1676_v6 }
 0x8e5   :  { %3635 = vpow2.f32 %v2992_v56 }
 0x8e7   :  { %v3634_v55 = vpop.eup %3633 }
 0x8e8   :  { %v1566_v7 = vadd.f32 1.0, %v3634_v55 }
 0x8ea   :  { %3637 = vrcp.f32 %v1566_v7 }
 0x8ef   :  { %v3636_v8 = vpop.eup %3635 }
 0x8f0   :  { %v1680_v41 = vadd.f32 1.0, %v3636_v8 }
 0x8f2   :  { %3639 = vrcp.f32 %v1680_v41 }
 0x8f4   :  { %v3638_v38 = vpop.eup %3637 }
 0x8f5   :  { %v1569_v42 = vmul.f32 %v3638_v38, %v4355_v16 }
 0x8f7   :  { %v1570_v14 = vadd.f32 %v1569_v42, %v4363_v51 }
 0x8f9   :  { %1573 = vrot.lane.b32.xlu0 %v1570_v14, %s3836_s15  ;;  %v1571_v3 = vmul.f32 %v1570_v14, %v4415_v19 }
 0x8fc   :  { %v3640_v35 = vpop.eup %3639 }
 0x8fd   :  { %v1683_v32 = vmul.f32 %v3640_v35, %v4355_v16 }
 0x8ff   :  { %v1684_v33 = vadd.f32 %v1683_v32, %v4363_v51 }
 0x901   :  { %1687 = vrot.lane.b32.xlu1 %v1684_v33, %s3836_s15  ;;  %v1685_v12 = vmul.f32 %v1684_v33, %v4419_v23 }
 0x96b   :  { %v1574_v36 = vpop.permute.xlu0 %1573 }
 0x96c   :  { %v1576_v10 = vmul.f32 %v1574_v36, %v1570_v14 }
 0x96e   :  { %1578 = vrot.lane.b32.xlu0 %v1576_v10, %s3843_s5 }
 0x973   :  { %v1688_v50 = vpop.permute.xlu1 %1687 }
 0x974   :  { %v1690_v2 = vmul.f32 %v1688_v50, %v1684_v33 }
 0x976   :  { %1692 = vrot.lane.b32.xlu1 %v1690_v2, %s3843_s5 }
 0x9e0   :  { %v1579_v5 = vpop.permute.xlu0 %1578 }
 0x9e1   :  { %v4476_v11 = vadd.f32 %v1579_v5, %v1571_v3 }
 0x9e3   :  { %3641 = vtanh.f32 %v4476_v11 }
 0x9e8   :  { %v1693_v15 = vpop.permute.xlu1 %1692 }
 0x9e9   :  { %v4480_v17 = vadd.f32 %v1693_v15, %v1685_v12 }
 0x9eb   :  { %3643 = vtanh.f32 %v4480_v17 }
 0x9ed   :  { %v3642_v24 = vpop.eup %3641 }
 0x9ee   :  { %1584 = vrot.lane.b32.xlu0 %v3642_v24, %s3836_s15 }
 0x9f5   :  { %v3644_v20 = vpop.eup %3643 }
 0x9f6   :  { %1698 = vrot.lane.b32.xlu1 %v3644_v20, %s3836_s15 }
 0xa60   :  { %v1585_v21 = vpop.permute.xlu0 %1584 }
 0xa61   :  { %v4485_v19 = vmul.f32 %v1585_v21, %v1570_v14 }
 0xa63   :  { %v1588_v26 = vpack.c.bf16 %v4485_v19, %v4485_v19 }
 0xa65   :  { %1590 = vrot.lane.b32.xlu0 %v1588_v26, %s3843_s5 }
 0xa68   :  { %v1699_v23 = vpop.permute.xlu1 %1698 }
 0xa69   :  { %v1701_v52 = vmul.f32 %v1699_v23, %v1684_v33 }
 0xa6b   :  { %v1702_v53 = vpack.c.bf16 %v1701_v52, %v1701_v52 }
 0xa6d   :  { %1704 = vrot.lane.b32.xlu1 %v1702_v53, %s3843_s5 }
 0xad7   :  { %v1591_v28 = vpop.permute.xlu0 %1590 }
 0xad8   :  { %3307 = vmatmul.mubr.msk.bf16.vlgmr.msra.gmra.mrb[56].mxu1 %vm1233_vm6, %v1591_v28 }
 0xad9   :  { %3319 = vmatpush3.bf16.msra.mxu1 %v4375_v29  ;;  %3322 = vmatprep.mubr.msk.bf16.mxu1 %vm3841_vm2, %v3840_v25 }
 0xada   :  { %3320 = vmatprep.subr.bf16.mxu1 %v3840_v25 }
 0xadd   :  { %3321 = vmatpush3.bf16.msra.mxu1 %v4381_v30 }
 0xade   :  { %3334 = vmatprep.subr.bf16.mxu1 %v3840_v25 }
 0xadf   :  { %v1705_v43 = vpop.permute.xlu1 %1704 }
 0xae4   :  { %3323 = vmatmul.mubr.msk.bf16.vlgmr.msra.gmra.mrb[56].mxu1 %vm1233_vm6, %v1705_v43 }
 0xae5   :  { %3335 = vmatpush3.bf16.msra.mxu1 %v4285_v9  ;;  %3338 = vmatprep.mubr.msk.bf16.mxu1 %vm3841_vm2, %v3840_v25 }
 0xae6   :  { %3336 = vmatprep.subr.bf16.mxu1 %v3840_v25 }
 0xae9   :  { %3337 = vmatpush3.bf16.msra.mxu1 %v4288_v34 }
 0xaea   :  { %3350 = vmatprep.subr.bf16.mxu1 %v3840_v25 }
 0xaec   :  { %3339 = vmatmul.mubr.msk.bf16.vlgmr.msra.gmra.mrb[60].mxu1 %vm1233_vm6, %v1705_v43 }
 0xaed   :  { %3351 = vmatpush3.bf16.msra.mxu1 %v4422_v27  ;;  %3354 = vmatprep.mubr.msk.bf16.mxu1 %vm3841_vm2, %v3840_v25 }
 0xaee   :  { %3352 = vmatprep.subr.bf16.mxu1 %v3840_v25 }
 0xaf1   :  { %3353 = vmatpush3.bf16.msra.mxu1 %v4426_v4 }
 0xaf2   :  { %3366 = vmatprep.subr.bf16.mxu1 %v3840_v25 }
 0xbb7   :  { %v1743_v46 = vpop.f32.mrb[56].mxu1 }
 0xbb8   :  { %v3459_v45 = vadd.f32 %v4401_v58, %v1743_v46  ;;  %v3324_v47 = vpop.f32.mrb[57].mxu1 }
 0xbb9   :  { %v1746_v31 = vpop.f32.mrb[58].mxu1 }
 0xbba   :  { %v1749_v39 = vmul.f32 %v3459_v45, %v4355_v16  ;;  %v3325_v40 = vpop.f32.mrb[59].mxu1 }
 0xbbc   :  { %v2994_v48 = vmul.f32 -1.442695, %v1749_v39 }
 0xbbe   :  { %3645 = vpow2.f32 %v2994_v48 }
 0xbbf   :  { %v1856_v49 = vpop.f32.mrb[60].mxu1 }
 0xbc0   :  { %v1862_v59 = vadd.f32 %v1856_v49, %v4337_v44  ;;  %v3340_v60 = vpop.f32.mrb[61].mxu1 }
 0xbc1   :  { %v1859_v62 = vpop.f32.mrb[62].mxu1 }
 0xbc2   :  { %v1863_v61 = vmul.f32 %v1862_v59, %v4355_v16  ;;  %v3341_v0 = vpop.f32.mrb[63].mxu1 }
 0xbc4   :  { %v2997_v63 = vmul.f32 -1.442695, %v1863_v61 }
 0xbc6   :  { %3647 = vpow2.f32 %v2997_v63 }
 0xbc8   :  { %v3646_v1 = vpop.eup %3645 }
 0xbc9   :  { %v1753_v6 = vadd.f32 1.0, %v3646_v1 }
 0xbcb   :  { %3649 = vrcp.f32 %v1753_v6 }
 0xbd0   :  { %v3648_v54 = vpop.eup %3647 }
 0xbd1   :  { %v1867_v56 = vadd.f32 1.0, %v3648_v54 }
 0xbd3   :  { %3651 = vrcp.f32 %v1867_v56 }
 0xbd5   :  { %v3650_v55 = vpop.eup %3649 }
 0xbd6   :  { %v1756_v7 = vmul.f32 %v3650_v55, %v4355_v16 }
 0xbd8   :  { %v1757_v8 = vadd.f32 %v1756_v7, %v4363_v51 }
 0xbda   :  { %1760 = vrot.lane.b32.xlu0 %v1757_v8, %s3836_s15  ;;  %v1758_v33 = vmul.f32 %v1757_v8, %v4476_v11 }
 0xbdd   :  { %v3652_v44 = vpop.eup %3651 }
 0xbde   :  { %v1870_v41 = vmul.f32 %v3652_v44, %v4355_v16 }
 0xbe0   :  { %v1871_v38 = vadd.f32 %v1870_v41, %v4363_v51 }
 0xbe2   :  { %1874 = vrot.lane.b32.xlu1 %v1871_v38, %s3836_s15  ;;  %v1872_v50 = vmul.f32 %v1871_v38, %v4480_v17 }
 0xc4c   :  { %v1761_v42 = vpop.permute.xlu0 %1760 }
 0xc4d   :  { %v1763_v14 = vmul.f32 %v1761_v42, %v1757_v8 }
 0xc4f   :  { %1765 = vrot.lane.b32.xlu0 %v1763_v14, %s3843_s5 }
 0xc54   :  { %v1875_v35 = vpop.permute.xlu1 %1874 }
 0xc55   :  { %v1877_v32 = vmul.f32 %v1875_v35, %v1871_v38 }
 0xc57   :  { %1879 = vrot.lane.b32.xlu1 %v1877_v32, %s3843_s5 }
 0xcc1   :  { %v1766_v36 = vpop.permute.xlu0 %1765 }
 0xcc2   :  { %v4525_v10 = vadd.f32 %v1766_v36, %v1758_v33 }
 0xcc4   :  { %3653 = vtanh.f32 %v4525_v10 }
 0xcc9   :  { %v1880_v2 = vpop.permute.xlu1 %1879 }
 0xcca   :  { %v4529_v3 = vadd.f32 %v1880_v2, %v1872_v50 }
 0xccc   :  { %3655 = vtanh.f32 %v4529_v3 }
 0xcce   :  { %v3654_v5 = vpop.eup %3653 }
 0xccf   :  { %1771 = vrot.lane.b32.xlu0 %v3654_v5, %s3836_s15 }
 0xcd6   :  { %v3656_v12 = vpop.eup %3655 }
 0xcd7   :  { %1885 = vrot.lane.b32.xlu1 %v3656_v12, %s3836_s15 }
 0xd41   :  { %v1772_v15 = vpop.permute.xlu0 %1771 }
 0xd42   :  { %v4534_v11 = vmul.f32 %v1772_v15, %v1757_v8 }
 0xd44   :  { %v1775_v24 = vpack.c.bf16 %v4534_v11, %v4534_v11 }
 0xd46   :  { %1777 = vrot.lane.b32.xlu0 %v1775_v24, %s3843_s5 }
 0xd49   :  { %v1886_v17 = vpop.permute.xlu1 %1885 }
 0xd4a   :  { %v1888_v20 = vmul.f32 %v1886_v17, %v1871_v38 }
 0xd4c   :  { %v1889_v21 = vpack.c.bf16 %v1888_v20, %v1888_v20 }
 0xd4e   :  { %1891 = vrot.lane.b32.xlu1 %v1889_v21, %s3843_s5 }
 0xdb8   :  { %v1778_v26 = vpop.permute.xlu0 %1777 }
 0xdb9   :  { %3331 = vmatmul.mubr.msk.bf16.vlgmr.msra.gmra.mrb[60].mxu0 %vm1233_vm6, %v1778_v26 }
 0xdba   :  { %3343 = vmatpush3.bf16.msra.mxu0 %v4375_v29  ;;  %3346 = vmatprep.mubr.msk.bf16.mxu0 %vm3841_vm2, %v3840_v25 }
 0xdbb   :  { %3344 = vmatprep.subr.bf16.mxu0 %v3840_v25 }
 0xdbe   :  { %3345 = vmatpush3.bf16.msra.mxu0 %v4381_v30 }
 0xdbf   :  { %3358 = vmatprep.subr.bf16.mxu0 %v3840_v25 }
 0xdc0   :  { %v1892_v23 = vpop.permute.xlu1 %1891 }
 0xdc5   :  { %3347 = vmatmul.mubr.msk.bf16.vlgmr.msra.gmra.mrb[60].mxu0 %vm1233_vm6, %v1892_v23 }
 0xdc6   :  { %3359 = vmatpush3.bf16.msra.mxu0 %v4285_v9  ;;  %3362 = vmatprep.mubr.msk.bf16.mxu0 %vm3841_vm2, %v3840_v25 }
 0xdc7   :  { %3360 = vmatprep.subr.bf16.mxu0 %v3840_v25 }
 0xdca   :  { %3361 = vmatpush3.bf16.msra.mxu0 %v4288_v34 }
 0xdcb   :  { %3374 = vmatprep.subr.bf16.mxu0 %v3840_v25 }
 0xdcd   :  { %3363 = vmatmul.mubr.msk.bf16.vlgmr.msra.gmra.mrb[64].mxu0 %vm1233_vm6, %v1892_v23 }
 0xdce   :  { %3375 = vmatpush3.bf16.msra.mxu0 %v4422_v27  ;;  %3378 = vmatprep.mubr.msk.bf16.mxu0 %vm3841_vm2, %v3840_v25 }
 0xdcf   :  { %3376 = vmatprep.subr.bf16.mxu0 %v3840_v25 }
 0xdd2   :  { %3377 = vmatpush3.bf16.msra.mxu0 %v4426_v4 }
 0xdd3   :  { %3390 = vmatprep.subr.bf16.mxu0 %v3840_v25 }
 0xe98   :  { %v1930_v52 = vpop.f32.mrb[60].mxu0 }
 0xe99   :  { %v3460_v53 = vadd.f32 %v4401_v58, %v1930_v52  ;;  %v3348_v28 = vpop.f32.mrb[61].mxu0 }
 0xe9a   :  { %v1933_v43 = vpop.f32.mrb[62].mxu0 }
 0xe9b   :  { %v1936_v46 = vmul.f32 %v3460_v53, %v4355_v16  ;;  %v3349_v45 = vpop.f32.mrb[63].mxu0 }
 0xe9d   :  { %v2999_v47 = vmul.f32 -1.442695, %v1936_v46 }
 0xe9f   :  { %3657 = vpow2.f32 %v2999_v47 }
 0xea0   :  { %v2043_v31 = vpop.f32.mrb[64].mxu0 }
 0xea1   :  { %v2049_v39 = vadd.f32 %v2043_v31, %v4341_v57  ;;  %v3364_v40 = vpop.f32.mrb[65].mxu0 }
 0xea2   :  { %v2046_v48 = vpop.f32.mrb[66].mxu0 }
 0xea3   :  { %v2050_v49 = vmul.f32 %v2049_v39, %v4355_v16  ;;  %v3365_v59 = vpop.f32.mrb[67].mxu0 }
 0xea5   :  { %v3002_v60 = vmul.f32 -1.442695, %v2050_v49 }
 0xea7   :  { %3659 = vpow2.f32 %v3002_v60 }
 0xea9   :  { %v3658_v62 = vpop.eup %3657 }
 0xeaa   :  { %v1940_v61 = vadd.f32 1.0, %v3658_v62 }
 0xeac   :  { %3661 = vrcp.f32 %v1940_v61 }
 0xeb1   :  { %v3660_v0 = vpop.eup %3659 }
 0xeb2   :  { %v2054_v63 = vadd.f32 1.0, %v3660_v0 }
 0xeb4   :  { %3663 = vrcp.f32 %v2054_v63 }
 0xeb6   :  { %v3662_v1 = vpop.eup %3661 }
 0xeb7   :  { %v1943_v6 = vmul.f32 %v3662_v1, %v4355_v16 }
 0xeb9   :  { %v1944_v54 = vadd.f32 %v1943_v6, %v4363_v51 }
 0xebb   :  { %1947 = vrot.lane.b32.xlu0 %v1944_v54, %s3836_s15  ;;  %v1945_v38 = vmul.f32 %v1944_v54, %v4525_v10 }
 0xebe   :  { %v3664_v57 = vpop.eup %3663 }
 0xebf   :  { %v2057_v56 = vmul.f32 %v3664_v57, %v4355_v16 }
 0xec1   :  { %v2058_v55 = vadd.f32 %v2057_v56, %v4363_v51 }
 0xec3   :  { %2061 = vrot.lane.b32.xlu1 %v2058_v55, %s3836_s15  ;;  %v2059_v35 = vmul.f32 %v2058_v55, %v4529_v3 }
 0xf2d   :  { %v1948_v7 = vpop.permute.xlu0 %1947 }
 0xf2e   :  { %v1950_v8 = vmul.f32 %v1948_v7, %v1944_v54 }
 0xf30   :  { %1952 = vrot.lane.b32.xlu0 %v1950_v8, %s3843_s5 }
 0xf35   :  { %v2062_v44 = vpop.permute.xlu1 %2061 }
 0xf36   :  { %v2064_v41 = vmul.f32 %v2062_v44, %v2058_v55 }
 0xf38   :  { %2066 = vrot.lane.b32.xlu1 %v2064_v41, %s3843_s5 }
 0xfa2   :  { %v1953_v42 = vpop.permute.xlu0 %1952 }
 0xfa3   :  { %v4574_v14 = vadd.f32 %v1953_v42, %v1945_v38 }
 0xfa5   :  { %3665 = vtanh.f32 %v4574_v14 }
 0xfaa   :  { %v2067_v32 = vpop.permute.xlu1 %2066 }
 0xfab   :  { %v4578_v33 = vadd.f32 %v2067_v32, %v2059_v35 }
 0xfad   :  { %3667 = vtanh.f32 %v4578_v33 }
 0xfaf   :  { %v3666_v36 = vpop.eup %3665 }
 0xfb0   :  { %1958 = vrot.lane.b32.xlu0 %v3666_v36, %s3836_s15 }
 0xfb7   :  { %v3668_v50 = vpop.eup %3667 }
 0xfb8   :  { %2072 = vrot.lane.b32.xlu1 %v3668_v50, %s3836_s15 }
0x1022   :  { %v1959_v2 = vpop.permute.xlu0 %1958 }
0x1023   :  { %v4583_v10 = vmul.f32 %v1959_v2, %v1944_v54 }
0x1025   :  { %v1962_v5 = vpack.c.bf16 %v4583_v10, %v4583_v10 }
0x1027   :  { %1964 = vrot.lane.b32.xlu0 %v1962_v5, %s3843_s5  ;;  %v4646_v5 = vld [vmem:[#allocation5] sm:$0xff]  }
0x102a   :  { %v2073_v3 = vpop.permute.xlu1 %2072 }
0x102b   :  { %v2075_v12 = vmul.f32 %v2073_v3, %v2058_v55  ;;  %v4652_v3 = vld [vmem:[#allocation5 + $0x8] sm:$0xff]  }
0x102d   :  { %v2076_v15 = vpack.c.bf16 %v2075_v12, %v2075_v12 }
0x102f   :  { %2078 = vrot.lane.b32.xlu1 %v2076_v15, %s3843_s5 }
0x1099   :  { %v1965_v24 = vpop.permute.xlu0 %1964 }
0x109a   :  { %3355 = vmatmul.mubr.msk.bf16.vlgmr.msra.gmra.mrb[64].mxu1 %vm1233_vm6, %v1965_v24 }
0x109b   :  { %3367 = vmatpush3.bf16.msra.mxu1 %v4375_v29  ;;  %3370 = vmatprep.mubr.msk.bf16.mxu1 %vm3841_vm2, %v3840_v25 }
0x109c   :  { %3368 = vmatprep.subr.bf16.mxu1 %v3840_v25 }
0x109f   :  { %3369 = vmatpush3.bf16.msra.mxu1 %v4381_v30 }
0x10a0   :  { %3382 = vmatprep.subr.bf16.mxu1 %v3840_v25 }
0x10a1   :  { %v2079_v17 = vpop.permute.xlu1 %2078 }
0x10a6   :  { %3371 = vmatmul.mubr.msk.bf16.vlgmr.msra.gmra.mrb[64].mxu1 %vm1233_vm6, %v2079_v17 }
0x10a7   :  { %3383 = vmatpush3.bf16.msra.mxu1 %v4285_v9  ;;  %3386 = vmatprep.mubr.msk.bf16.mxu1 %vm3841_vm2, %v3840_v25 }
0x10a8   :  { %3384 = vmatprep.subr.bf16.mxu1 %v3840_v25 }
0x10ab   :  { %3385 = vmatpush3.bf16.msra.mxu1 %v4288_v34 }
0x10ac   :  { %3398 = vmatprep.subr.bf16.mxu1 %v3840_v25 }
0x10ae   :  { %3387 = vmatmul.mubr.msk.bf16.vlgmr.msra.gmra.mrb[68].mxu1 %vm1233_vm6, %v2079_v17 }
0x10af   :  { %3399 = vmatpush3.bf16.msra.mxu1 %v4422_v27  ;;  %3402 = vmatprep.mubr.msk.bf16.mxu1 %vm3841_vm2, %v3840_v25 }
0x10b0   :  { %3400 = vmatprep.subr.bf16.mxu1 %v3840_v25 }
0x10b3   :  { %3401 = vmatpush3.bf16.msra.mxu1 %v4426_v4 }
0x10b4   :  { %3414 = vmatprep.subr.bf16.mxu1 %v3840_v25 }
0x1179   :  { %v2117_v9 = vpop.f32.mrb[64].mxu1 }
0x117a   :  { %v3461_v20 = vadd.f32 %v4401_v58, %v2117_v9  ;;  %v3372_v21 = vpop.f32.mrb[65].mxu1 }
0x117b   :  { %v2120_v34 = vpop.f32.mrb[66].mxu1 }
0x117c   :  { %v2123_v26 = vmul.f32 %v3461_v20, %v4355_v16  ;;  %v3373_v23 = vpop.f32.mrb[67].mxu1 }
0x117e   :  { %v3004_v52 = vmul.f32 -1.442695, %v2123_v26 }
0x1180   :  { %3669 = vpow2.f32 %v3004_v52 }
0x1181   :  { %v2230_v53 = vpop.f32.mrb[68].mxu1 }
0x1182   :  { %v2236_v28 = vadd.f32 %v2230_v53, %v4343_v37  ;;  %v3388_v43 = vpop.f32.mrb[69].mxu1 }
0x1183   :  { %v2233_v46 = vpop.f32.mrb[70].mxu1 }
0x1184   :  { %v2237_v45 = vmul.f32 %v2236_v28, %v4355_v16  ;;  %v3389_v47 = vpop.f32.mrb[71].mxu1 }
0x1186   :  { %v3007_v31 = vmul.f32 -1.442695, %v2237_v45 }
0x1188   :  { %3671 = vpow2.f32 %v3007_v31 }
0x118a   :  { %v3670_v39 = vpop.eup %3669 }
0x118b   :  { %v2127_v40 = vadd.f32 1.0, %v3670_v39 }
0x118d   :  { %3673 = vrcp.f32 %v2127_v40 }
0x1192   :  { %v3672_v48 = vpop.eup %3671 }
0x1193   :  { %v2241_v49 = vadd.f32 1.0, %v3672_v48 }
0x1195   :  { %3675 = vrcp.f32 %v2241_v49 }
0x1197   :  { %v3674_v59 = vpop.eup %3673 }
0x1198   :  { %v2130_v60 = vmul.f32 %v3674_v59, %v4355_v16 }
0x119a   :  { %v2131_v62 = vadd.f32 %v2130_v60, %v4363_v51 }
0x119c   :  { %2134 = vrot.lane.b32.xlu0 %v2131_v62, %s3836_s15  ;;  %v2132_v57 = vmul.f32 %v2131_v62, %v4574_v14 }
0x119f   :  { %v3676_v37 = vpop.eup %3675 }
0x11a0   :  { %v2244_v61 = vmul.f32 %v3676_v37, %v4355_v16 }
0x11a2   :  { %v2245_v0 = vadd.f32 %v2244_v61, %v4363_v51 }
0x11a4   :  { %2248 = vrot.lane.b32.xlu1 %v2245_v0, %s3836_s15  ;;  %v2246_v7 = vmul.f32 %v2245_v0, %v4578_v33 }
0x120e   :  { %v2135_v63 = vpop.permute.xlu0 %2134 }
0x120f   :  { %v2137_v1 = vmul.f32 %v2135_v63, %v2131_v62 }
0x1211   :  { %2139 = vrot.lane.b32.xlu0 %v2137_v1, %s3843_s5 }
0x1216   :  { %v2249_v6 = vpop.permute.xlu1 %2248 }
0x1217   :  { %v2251_v54 = vmul.f32 %v2249_v6, %v2245_v0 }
0x1219   :  { %2253 = vrot.lane.b32.xlu1 %v2251_v54, %s3843_s5 }
0x1283   :  { %v2140_v56 = vpop.permute.xlu0 %2139 }
0x1284   :  { %v4623_v55 = vadd.f32 %v2140_v56, %v2132_v57 }
0x1286   :  { %3677 = vtanh.f32 %v4623_v55 }
0x128b   :  { %v2254_v8 = vpop.permute.xlu1 %2253 }
0x128c   :  { %v4627_v44 = vadd.f32 %v2254_v8, %v2246_v7 }
0x128e   :  { %3679 = vtanh.f32 %v4627_v44 }
0x1290   :  { %v3678_v41 = vpop.eup %3677 }
0x1291   :  { %2145 = vrot.lane.b32.xlu0 %v3678_v41, %s3836_s15 }
0x1298   :  { %v3680_v38 = vpop.eup %3679 }
0x1299   :  { %2259 = vrot.lane.b32.xlu1 %v3680_v38, %s3836_s15 }
0x1303   :  { %v2146_v42 = vpop.permute.xlu0 %2145 }
0x1304   :  { %v4632_v14 = vmul.f32 %v2146_v42, %v2131_v62 }
0x1306   :  { %v2149_v35 = vpack.c.bf16 %v4632_v14, %v4632_v14 }
0x1308   :  { %2151 = vrot.lane.b32.xlu0 %v2149_v35, %s3843_s5 }
0x130b   :  { %v2260_v32 = vpop.permute.xlu1 %2259 }
0x130c   :  { %v2262_v33 = vmul.f32 %v2260_v32, %v2245_v0 }
0x130e   :  { %v2263_v36 = vpack.c.bf16 %v2262_v33, %v2262_v33 }
0x1310   :  { %2265 = vrot.lane.b32.xlu1 %v2263_v36, %s3843_s5 }
0x137a   :  { %v2152_v50 = vpop.permute.xlu0 %2151 }
0x137b   :  { %3379 = vmatmul.mubr.msk.bf16.vlgmr.msra.gmra.mrb[68].mxu0 %vm1233_vm6, %v2152_v50 }
0x137c   :  { %3391 = vmatpush3.bf16.msra.mxu0 %v4375_v29  ;;  %3394 = vmatprep.mubr.msk.bf16.mxu0 %vm3841_vm2, %v3840_v25 }
0x137d   :  { %3392 = vmatprep.subr.bf16.mxu0 %v3840_v25 }
0x1380   :  { %3393 = vmatpush3.bf16.msra.mxu0 %v4381_v30 }
0x1381   :  { %3406 = vmatprep.subr.bf16.mxu0 %v3840_v25 }
0x1382   :  { %v2266_v2 = vpop.permute.xlu1 %2265 }
0x1387   :  { %3395 = vmatmul.mubr.msk.bf16.vlgmr.msra.gmra.mrb[68].mxu0 %vm1233_vm6, %v2266_v2 }
0x1388   :  { %3407 = vmatpush3.bf16.msra.mxu0 %v4646_v5  ;;  %3410 = vmatprep.mubr.msk.bf16.mxu0 %vm3841_vm2, %v3840_v25 }
0x1389   :  { %3408 = vmatprep.subr.bf16.mxu0 %v3840_v25 }
0x138c   :  { %3409 = vmatpush3.bf16.msra.mxu0 %v4652_v3 }
0x138d   :  { %3422 = vmatprep.subr.bf16.mxu0 %v3840_v25 }
0x138f   :  { %3411 = vmatmul.mubr.msk.bf16.vlgmr.msra.gmra.mrb[72].mxu0 %vm1233_vm6, %v2266_v2 }
0x1390   :  { %3423 = vmatpush3.bf16.msra.mxu0 %v4422_v27  ;;  %3426 = vmatprep.mubr.msk.bf16.mxu0 %vm3841_vm2, %v3840_v25 }
0x1391   :  { %3424 = vmatprep.subr.bf16.mxu0 %v3840_v25 }
0x1394   :  { %3425 = vmatpush3.bf16.msra.mxu0 %v4426_v4 }
0x1395   :  { %3438 = vmatprep.subr.bf16.mxu0 %v3840_v25 }
0x145a   :  { %v2304_v12 = vpop.f32.mrb[68].mxu0 }
0x145b   :  { %v3462_v15 = vadd.f32 %v4401_v58, %v2304_v12  ;;  %v3396_v24 = vpop.f32.mrb[69].mxu0 }
0x145c   :  { %v2307_v17 = vpop.f32.mrb[70].mxu0 }
0x145d   :  { %v2310_v9 = vmul.f32 %v3462_v15, %v4355_v16  ;;  %v3397_v20 = vpop.f32.mrb[71].mxu0 }
0x145f   :  { %v3009_v21 = vmul.f32 -1.442695, %v2310_v9 }
0x1461   :  { %3681 = vpow2.f32 %v3009_v21 }
0x1462   :  { %v2417_v27 = vpop.f32.mrb[72].mxu0 }
0x1463   :  { %v2423_v34 = vadd.f32 %v2417_v27, %v4351_v13  ;;  %v3412_v26 = vpop.f32.mrb[73].mxu0 }
0x1464   :  { %v2420_v23 = vpop.f32.mrb[74].mxu0 }
0x1465   :  { %v2424_v52 = vmul.f32 %v2423_v34, %v4355_v16  ;;  %v3413_v4 = vpop.f32.mrb[75].mxu0 }
0x1467   :  { %v3012_v53 = vmul.f32 -1.442695, %v2424_v52 }
0x1469   :  { %3683 = vpow2.f32 %v3012_v53 }
0x146b   :  { %v3682_v28 = vpop.eup %3681 }
0x146c   :  { %v2314_v43 = vadd.f32 1.0, %v3682_v28 }
0x146e   :  { %3685 = vrcp.f32 %v2314_v43 }
0x1473   :  { %v3684_v46 = vpop.eup %3683 }
0x1474   :  { %v2428_v45 = vadd.f32 1.0, %v3684_v46 }
0x1476   :  { %3687 = vrcp.f32 %v2428_v45 }
0x1478   :  { %v3686_v47 = vpop.eup %3685 }
0x1479   :  { %v2317_v31 = vmul.f32 %v3686_v47, %v4355_v16 }
0x147b   :  { %v2318_v39 = vadd.f32 %v2317_v31, %v4363_v51 }
0x147d   :  { %2321 = vrot.lane.b32.xlu0 %v2318_v39, %s3836_s15  ;;  %v2319_v37 = vmul.f32 %v2318_v39, %v4623_v55 }
0x1480   :  { %v3688_v13 = vpop.eup %3687 }
0x1481   :  { %v2431_v40 = vmul.f32 %v3688_v13, %v4355_v16 }
0x1483   :  { %v2432_v48 = vadd.f32 %v2431_v40, %v4363_v51 }
0x1485   :  { %2435 = vrot.lane.b32.xlu1 %v2432_v48, %s3836_s15  ;;  %v2433_v63 = vmul.f32 %v2432_v48, %v4627_v44 }
0x14ef   :  { %v2322_v49 = vpop.permute.xlu0 %2321 }
0x14f0   :  { %v2324_v59 = vmul.f32 %v2322_v49, %v2318_v39 }
0x14f2   :  { %2326 = vrot.lane.b32.xlu0 %v2324_v59, %s3843_s5 }
0x14f7   :  { %v2436_v60 = vpop.permute.xlu1 %2435 }
0x14f8   :  { %v2438_v62 = vmul.f32 %v2436_v60, %v2432_v48 }
0x14fa   :  { %2440 = vrot.lane.b32.xlu1 %v2438_v62, %s3843_s5 }
0x1564   :  { %v2327_v61 = vpop.permute.xlu0 %2326 }
0x1565   :  { %v4676_v0 = vadd.f32 %v2327_v61, %v2319_v37 }
0x1567   :  { %3689 = vtanh.f32 %v4676_v0 }
0x156c   :  { %v2441_v1 = vpop.permute.xlu1 %2440 }
0x156d   :  { %v4680_v6 = vadd.f32 %v2441_v1, %v2433_v63  ;;  %v3713_v63 = vld [vmem:[%s4806_s6] sm:$0xff]   ;;  %v3714_v1 = vld [vmem:[%s4806_s6 + $0x8] sm:$0xff]  }
0x156f   :  { %3691 = vtanh.f32 %v4680_v6 }
0x1571   :  { %v3690_v54 = vpop.eup %3689 }
0x1572   :  { %2332 = vrot.lane.b32.xlu0 %v3690_v54, %s3836_s15 }
0x1579   :  { %v3692_v57 = vpop.eup %3691 }
0x157a   :  { %2446 = vrot.lane.b32.xlu1 %v3692_v57, %s3836_s15  ;;  %v3715_v57 = vld [vmem:[%s4808_s8] ss:$0 sm:$0xff] }
0x15e4   :  { %v2333_v56 = vpop.permute.xlu0 %2332 }
0x15e5   :  { %v4685_v55 = vmul.f32 %v2333_v56, %v2318_v39 }
0x15e7   :  { %v2336_v7 = vpack.c.bf16 %v4685_v55, %v4685_v55 }
0x15e9   :  { %2338 = vrot.lane.b32.xlu0 %v2336_v7, %s3843_s5 }
0x15ec   :  { %v2447_v8 = vpop.permute.xlu1 %2446 }
0x15ed   :  { %v2449_v44 = vmul.f32 %v2447_v8, %v2432_v48 }
0x15ef   :  { %v2450_v41 = vpack.c.bf16 %v2449_v44, %v2449_v44 }
0x15f1   :  { %2452 = vrot.lane.b32.xlu1 %v2450_v41, %s3843_s5 }
0x165b   :  { %v2339_v38 = vpop.permute.xlu0 %2338 }
0x165c   :  { %3403 = vmatmul.mubr.msk.bf16.vlgmr.msra.gmra.mrb[72].mxu1 %vm1233_vm6, %v2339_v38 }
0x165d   :  { %3415 = vmatpush3.bf16.msra.mxu1 %v4375_v29  ;;  %3418 = vmatprep.mubr.msk.bf16.mxu1 %vm3841_vm2, %v3840_v25 }
0x165e   :  { %3416 = vmatprep.subr.bf16.mxu1 %v3840_v25 }
0x1661   :  { %3417 = vmatpush3.bf16.msra.mxu1 %v4381_v30 }
0x1662   :  { %3430 = vmatprep.subr.bf16.mxu1 %v3840_v25 }
0x1663   :  { %v2453_v42 = vpop.permute.xlu1 %2452 }
0x1668   :  { %3419 = vmatmul.mubr.msk.bf16.vlgmr.msra.gmra.mrb[72].mxu1 %vm1233_vm6, %v2453_v42 }
0x1669   :  { %3431 = vmatpush3.bf16.msra.mxu1 %v4646_v5  ;;  %3434 = vmatprep.mubr.msk.bf16.mxu1 %vm3841_vm2, %v3840_v25 }
0x166a   :  { %3432 = vmatprep.subr.bf16.mxu1 %v3840_v25 }
0x166d   :  { %3433 = vmatpush3.bf16.msra.mxu1 %v4652_v3 }
0x1670   :  { %3435 = vmatmul.mubr.msk.bf16.vlgmr.msra.gmra.mrb[76].mxu1 %vm1233_vm6, %v2453_v42 }
0x173b   :  { %v2491_v29 = vpop.f32.mrb[72].mxu1 }
0x173c   :  { %v3463_v35 = vadd.f32 %v4401_v58, %v2491_v29  ;;  %v3420_v30 = vpop.f32.mrb[73].mxu1 }
0x173d   :  { %v2494_v32 = vpop.f32.mrb[74].mxu1 }
0x173e   :  { %v2497_v33 = vmul.f32 %v3463_v35, %v4355_v16  ;;  %v3421_v36 = vpop.f32.mrb[75].mxu1 }
0x173f   :  { %v2710_v36 = vpack.c.bf16 %v4485_v19, %v4436_v22  ;;  %v3582_v22 = vld [vmem:[%s4809_s9 + $0x8] sm:$0xff]  }
0x1740   :  { %v3014_v50 = vmul.f32 -1.442695, %v2497_v33 }
0x1742   :  { %3693 = vpow2.f32 %v3014_v50  ;;  %v3581_v50 = vld [vmem:[%s4809_s9] sm:$0xff]   ;;  %s3844_s9 = smov [#allocation9]  }
0x1743   :  { %v2604_v2 = vpop.f32.mrb[76].mxu1  ;;  %3446 = vmatprep.subr.bf16.mxu1 %v3581_v50  ;;  %s2874_s27 = sshll.u32 %s3844_s9, 4  ;;  %s2875_s27 = int_to_ptr.vmem [resolvable:$true] %s2874_s27 }
0x1744   :  { %v2610_v5 = vadd.f32 %v2604_v2, %v4357_v18  ;;  %v3436_v12 = vpop.f32.mrb[77].mxu1  ;;  %3447 = vmatpush3.bf16.msra.mxu1 %v3581_v50  ;;  %s3782_s28 = scalar_lea.vmem %s2875_s27, 128  ;;  %p3787_p11 = scmp.lt.s32.totalorder %s2875_s27, %s2875_s27 }
0x1745   :  { %v2607_v15 = vpop.f32.mrb[78].mxu1  ;;  %3448 = vmatprep.subr.bf16.mxu1 %v3582_v22  ;;  %p3783_p10 = scmp.ne.s32.totalorder %s2875_s27, %s3782_s28  ;;  %p3788_p12 = scmp.lt.s32.totalorder %s3782_s28, %s3782_s28 }
0x1746   :  { %v2611_v24 = vmul.f32 %v2610_v5, %v4355_v16  ;;  %v3437_v3 = vpop.f32.mrb[79].mxu1 }
0x1747   :  { %p3789_p13 = por %p3788_p12, %p3787_p11 }
0x1748   :  { %v3017_v17 = vmul.f32 -1.442695, %v2611_v24  ;;  %3449 = vmatpush3.bf16.msra.mxu1 %v3582_v22 }
0x1749   :  { %p3790_p0 = pnand %p3789_p13, %p3783_p10 }
0x174a   :  { %3695 = vpow2.f32 %v3017_v17 }
0x174c   :  { %v3694_v9 = vpop.eup %3693 }
0x174d   :  { %v2501_v20 = vadd.f32 1.0, %v3694_v9 }
0x174f   :  { %3697 = vrcp.f32 %v2501_v20 }
0x1754   :  { %v3696_v58 = vpop.eup %3695 }
0x1755   :  { %v2615_v21 = vadd.f32 1.0, %v3696_v58 }
0x1757   :  { %3699 = vrcp.f32 %v2615_v21 }
0x1759   :  { %v3698_v27 = vpop.eup %3697 }
0x175a   :  { %v2504_v34 = vmul.f32 %v3698_v27, %v4355_v16 }
0x175c   :  { %v2505_v26 = vadd.f32 %v2504_v34, %v4363_v51 }
0x175e   :  { %2508 = vrot.lane.b32.xlu0 %v2505_v26, %s3836_s15  ;;  %v2506_v46 = vmul.f32 %v2505_v26, %v4676_v0 }
0x1761   :  { %v3700_v18 = vpop.eup %3699 }
0x1762   :  { %v2618_v23 = vmul.f32 %v3700_v18, %v4355_v16 }
0x1764   :  { %v2619_v52 = vadd.f32 %v2618_v23, %v4363_v51 }
0x1766   :  { %2622 = vrot.lane.b32.xlu1 %v2619_v52, %s3836_s15  ;;  %v2620_v31 = vmul.f32 %v2619_v52, %v4680_v6 }
0x17d0   :  { %v2509_v4 = vpop.permute.xlu0 %2508 }
0x17d1   :  { %v2511_v53 = vmul.f32 %v2509_v4, %v2505_v26 }
0x17d3   :  { %2513 = vrot.lane.b32.xlu0 %v2511_v53, %s3843_s5 }
0x17d8   :  { %v2623_v28 = vpop.permute.xlu1 %2622 }
0x17d9   :  { %v2625_v43 = vmul.f32 %v2623_v28, %v2619_v52 }
0x17db   :  { %2627 = vrot.lane.b32.xlu1 %v2625_v43, %s3843_s5 }
0x1845   :  { %v2514_v45 = vpop.permute.xlu0 %2513 }
0x1846   :  { %v2516_v47 = vadd.f32 %v2514_v45, %v2506_v46 }
0x1848   :  { %3701 = vtanh.f32 %v2516_v47 }
0x184d   :  { %v2628_v39 = vpop.permute.xlu1 %2627 }
0x184e   :  { %v2630_v13 = vadd.f32 %v2628_v39, %v2620_v31 }
0x1850   :  { %3703 = vtanh.f32 %v2630_v13 }
0x1852   :  { %v3702_v40 = vpop.eup %3701 }
0x1853   :  { %2519 = vrot.lane.b32.xlu0 %v3702_v40, %s3836_s15 }
0x185a   :  { %v3704_v48 = vpop.eup %3703 }
0x185b   :  { %2633 = vrot.lane.b32.xlu1 %v3704_v48, %s3836_s15 }
0x18c5   :  { %v2520_v49 = vpop.permute.xlu0 %2519 }
0x18c6   :  { %v4721_v59 = vmul.f32 %v2520_v49, %v2505_v26 }
0x18c8   :  { %v2523_v60 = vpack.c.bf16 %v4721_v59, %v4721_v59 }
0x18ca   :  { %2525 = vrot.lane.b32.xlu0 %v2523_v60, %s3843_s5 }
0x18cd   :  { %v2634_v62 = vpop.permute.xlu1 %2633 }
0x18ce   :  { %v2636_v37 = vmul.f32 %v2634_v62, %v2619_v52 }
0x18d0   :  { %v2637_v61 = vpack.c.bf16 %v2636_v37, %v2636_v37 }
0x18d2   :  { %2639 = vrot.lane.b32.xlu1 %v2637_v61, %s3843_s5 }
0x193c   :  { %v2526_v0 = vpop.permute.xlu0 %2525 }
0x193d   :  { %3427 = vmatmul.mubr.msk.bf16.vlgmr.msra.gmra.mrb[76].mxu0 %vm1233_vm6, %v2526_v0 }
0x193e   :  { %3439 = vmatpush3.bf16.msra.mxu0 %v3713_v63  ;;  %3442 = vmatprep.mubr.msk.bf16.mxu0 %vm3841_vm2, %v3840_v25 }
0x193f   :  { %3440 = vmatprep.subr.bf16.mxu0 %v3840_v25 }
0x1942   :  { %3441 = vmatpush3.bf16.msra.mxu0 %v3714_v1 }
0x1944   :  { %v2640_v6 = vpop.permute.xlu1 %2639 }
0x1949   :  { %3443 = vmatmul.mubr.msk.bf16.vlgmr.msra.gmra.mrb[76].mxu0 %vm1233_vm6, %v2640_v6 }
0x1a1c   :  { %v2678_v54 = vpop.f32.mrb[76].mxu0 }
0x1a1d   :  { %v3464_v56 = vadd.f32 %v3715_v57, %v2678_v54  ;;  %v3444_v7 = vpop.f32.mrb[77].mxu0 }
0x1a1e   :  { %v2681_v8 = vpop.f32.mrb[78].mxu0 }
0x1a1f   :  { %v2684_v44 = vmul.f32 %v3464_v56, %v4355_v16  ;;  %v3445_v41 = vpop.f32.mrb[79].mxu0 }
0x1a21   :  { %v3019_v25 = vmul.f32 -1.442695, %v2684_v44 }
0x1a23   :  { %3705 = vpow2.f32 %v3019_v25 }
0x1a2d   :  { %v3706_v38 = vpop.eup %3705 }
0x1a2e   :  { %v2688_v42 = vadd.f32 1.0, %v3706_v38 }
0x1a30   :  { %3707 = vrcp.f32 %v2688_v42 }
0x1a3a   :  { %v3708_v29 = vpop.eup %3707 }
0x1a3b   :  { %v2691_v35 = vmul.f32 %v3708_v29, %v4355_v16  ;;  %v2712_v16 = vpack.c.bf16 %v4685_v55, %v4632_v14  ;;  %v2711_v55 = vpack.c.bf16 %v4583_v10, %v4534_v11 }
0x1a3d   :  { %v2692_v30 = vadd.f32 %v2691_v35, %v4363_v51 }
0x1a3f   :  { %2695 = vrot.lane.b32.xlu0 %v2692_v30, %s3836_s15  ;;  %v2693_v51 = vmul.f32 %v2692_v30, %v2516_v47 }
0x1ab1   :  { %v2696_v32 = vpop.permute.xlu0 %2695 }
0x1ab2   :  { %v2698_v33 = vmul.f32 %v2696_v32, %v2692_v30 }
0x1ab4   :  { %2700 = vrot.lane.b32.xlu1 %v2698_v33, %s3843_s5 }
0x1ab8   :  { %2729 = vrot.lane.b32.xlu1 %v2710_v36, %s3843_s5 }
0x1abc   :  { %2733 = vrot.lane.b32.xlu1 %v2712_v16, %s3843_s5 }
0x1ac0   :  { %2835 = vrot.lane.b32.xlu1 %v2636_v37, %s3843_s5 }
0x1ac4   :  { %2843 = vrot.lane.b32.xlu1 %v2630_v13, %s3843_s5 }
0x1b26   :  { %v2701_v19 = vpop.permute.xlu1 %2700 }
0x1b27   :  { %v2703_v2 = vadd.f32 %v2701_v19, %v2693_v51 }
0x1b29   :  { %3709 = vtanh.f32 %v2703_v2 }
0x1b2a   :  { %v2730_v5 = vpop.permute.xlu1 %2729 }
0x1b2b   :  { %3450 = vmatprep.mubr.msk.bf16.mxu1 %vm1233_vm6, %v2730_v5 }
0x1b2e   :  { %v2734_v17 = vpop.permute.xlu1 %2733 }
0x1b32   :  { %v2836_v11 = vpop.permute.xlu1 %2835 }
0x1b33   :  { %v3710_v14 = vpop.eup %3709 }
0x1b34   :  { %2706 = vrot.lane.b32.xlu0 %v3710_v14, %s3836_s15 }
0x1b36   :  { %v2844_v58 = vpop.permute.xlu1 %2843 }
0x1b38   :  { %2731 = vrot.lane.b32.xlu0 %v2711_v55, %s3843_s5 }
0x1ba6   :  { %v2707_v12 = vpop.permute.xlu0 %2706 }
0x1ba7   :  { %v2709_v15 = vmul.f32 %v2707_v12, %v2692_v30 }
0x1ba9   :  { %v2713_v24 = vpack.c.bf16 %v2709_v15, %v4721_v59 }
0x1baa   :  { %v2732_v3 = vpop.permute.xlu0 %2731 }
0x1bab   :  { %2735 = vrot.lane.b32.xlu0 %v2713_v24, %s3843_s5  ;;  %3451 = vmatmul.mubr.msk.bf16.vlgmr.msra.gmra.mrb[80].mxu1 %vm1233_vm6, %v2732_v3 }
0x1bac   :  { %3454 = vmatprep.mubr.msk.bf16.mxu1 %vm1233_vm6, %v2734_v17 }
0x1baf   :  { %2839 = vrot.lane.b32.xlu0 %v2709_v15, %s3836_s15 }
0x1bb3   :  { %2847 = vrot.lane.b32.xlu0 %v2703_v2, %s3836_s15 }
0x1c1d   :  { %v2736_v9 = vpop.permute.xlu0 %2735 }
0x1c1e   :  { %3455 = vmatmul.mubr.msk.bf16.gmra.mrb[84].mxu1 %vm1233_vm6, %v2736_v9 }
0x1c21   :  { %v2840_v10 = vpop.permute.xlu0 %2839 }
0x1c22   :  { %v2850_v20 = vsel %vm1233_vm6, %v2836_v11, %v2840_v10 }
0x1c23   :  { %v2852_v21 = vsel %vm2851_vm7, %v2850_v20, %v2844_v58 }
0x1c25   :  { %v2848_v27 = vpop.permute.xlu0 %2847 }
0x1c26   :  { %v2854_v34 = vsel %vm2853_vm8, %v2852_v21, %v2848_v27 }
0x1c27   :  { %2855 = vst [vmem:[#allocation9] sm:$0xff] %v2854_v34 }
0x1c28   :  { %3793 = shalt.err (!%p3790_p0)
}
0x1c29   :  { %s3794_s22 = scalar_lea.hbm %s4812_s12, 128 }
0x1c2a   :  { %p3795_p1 = scmp.ne.s32.totalorder %s4812_s12, %s3794_s22  ;;  %p3798_p2 = scmp.lt.u32.totalorder %s3794_s22, %s4812_s12 }
0x1c2c   :  { %p3800_p3 = pnand %p3798_p2, %p3795_p1 }
0x1c2e   :  { %3803 = shalt.err (!%p3800_p3)
}
0x1c2f   :  { %2877 = dma.vmem_to_hbm [thread:$0]  %s2875_s27, 128, %s4812_s12, [#allocation10]   ;;  %v3020_v26 = vld [vmem:[%s4810_s10] ss:$0 sm:$0xff] }
0x1c30   :  { %s3845_s13 = smov [#allocation8]  }
0x1c31   :  { %s2861_s14 = sshll.u32 %s3845_s13, 4  ;;  %s2862_s14 = int_to_ptr.vmem [resolvable:$true] %s2861_s14 }
0x1c32   :  { %s3804_s10 = scalar_lea.vmem %s2862_s14, 1024  ;;  %p3809_p5 = scmp.lt.s32.totalorder %s2862_s14, %s2862_s14 }
0x1c33   :  { %p3805_p4 = scmp.ne.s32.totalorder %s2862_s14, %s3804_s10  ;;  %p3810_p6 = scmp.lt.s32.totalorder %s3804_s10, %s3804_s10 }
0x1c35   :  { %p3811_p7 = por %p3810_p6, %p3809_p5 }
0x1c37   :  { %p3812_p8 = pnand %p3811_p7, %p3805_p4 }
0x1c7e   :  { %v3452_v18 = vpop.f32.mrb[80].mxu1 }
0x1c7f   :  { %v2804_v23 = vadd.f32 %v3452_v18, %v3020_v26  ;;  %v2795_v52 = vpop.f32.mrb[81].mxu1 }
0x1c80   :  { %v2796_v4 = vadd.f32 %v3020_v26, %v2795_v52  ;;  %v3453_v53 = vpop.f32.mrb[82].mxu1 }
0x1c81   :  { %2828 = vst [vmem:[#allocation8 + $0x10] sm:$0xff] %v2804_v23  ;;  %v2807_v28 = vadd.f32 %v3453_v53, %v3020_v26  ;;  %v2798_v43 = vpop.f32.mrb[83].mxu1 }
0x1c82   :  { %2826 = vst [vmem:[#allocation8] sm:$0xff] %v2796_v4  ;;  %v2799_v46 = vadd.f32 %v3020_v26, %v2798_v43 }
0x1c83   :  { %2829 = vst [vmem:[#allocation8 + $0x18] sm:$0xff] %v2807_v28 }
0x1c84   :  { %2827 = vst [vmem:[#allocation8 + $0x8] sm:$0xff] %v2799_v46 }
0x1cf1   :  { %v3456_v45 = vpop.f32.mrb[84].mxu1 }
0x1cf2   :  { %v2820_v47 = vadd.f32 %v3456_v45, %v3020_v26  ;;  %v2811_v31 = vpop.f32.mrb[85].mxu1 }
0x1cf3   :  { %v2812_v39 = vadd.f32 %v3020_v26, %v2811_v31  ;;  %v3457_v13 = vpop.f32.mrb[86].mxu1 }
0x1cf4   :  { %2832 = vst [vmem:[#allocation8 + $0x30] sm:$0xff] %v2820_v47  ;;  %v2823_v40 = vadd.f32 %v3457_v13, %v3020_v26  ;;  %v2814_v48 = vpop.f32.mrb[87].mxu1 }
0x1cf5   :  { %2830 = vst [vmem:[#allocation8 + $0x20] sm:$0xff] %v2812_v39  ;;  %v2815_v49 = vadd.f32 %v3020_v26, %v2814_v48 }
0x1cf6   :  { %2833 = vst [vmem:[#allocation8 + $0x38] sm:$0xff] %v2823_v40 }
0x1cf7   :  { %2831 = vst [vmem:[#allocation8 + $0x28] sm:$0xff] %v2815_v49 }
0x1cf8   :  { %3815 = shalt.err (!%p3812_p8)
}
0x1cf9   :  { %s3816_s18 = scalar_lea.hbm %s4811_s11, 1024 }
0x1cfa   :  { %p3817_p9 = scmp.ne.s32.totalorder %s4811_s11, %s3816_s18  ;;  %p3820_p10 = scmp.lt.u32.totalorder %s3816_s18, %s4811_s11 }
0x1cfc   :  { %p3822_p11 = pnand %p3820_p10, %p3817_p9 }
0x1cfe   :  { %3825 = shalt.err (!%p3822_p11)
}
0x1cff   :  { %s3846_s3 = smov 128   ;;  %s3847_s24 = smov 8  }
0x1d00   :  { %2867 = dma.vmem_to_hbm [thread:$0]  %s2862_s14, 1024, %s4811_s11, [#allocation4], %s3846_s3, %s3846_s3, %s3847_s24  }
0x1d01   :  { %3830 = dma.done.wait [#allocation4], 1024  }
0x1d02   :  { %3831 = vsyncadd [#allocation4], 4294966272 }
0x1d03   :  { %3832 = dma.done.wait [#allocation10], 128  }
0x1d04   :  { %3833 = vsyncadd [#allocation10], 4294967168 }
0x1d05   :  { %2884 = vsyncpa [#allocation3], 1 }
0x1d06   :  { %2885 = vsyncpa [#allocation6], 1 }
0x1d07   :  { %2886 = vsyncpa [#allocation4], 1 }
0x1d08   :  { %2887 = vsyncpa [#allocation10], 1 }

</bundles_post_ra>
